<compile_context>
chip_gen: v7x
topology: tpu7x:2x2x1
jax: 0.10.0
libtpu: 0.0.40
codegen_flags: <defaults>
</compile_context>

<pallas_src>
import functools

import jax
import jax.numpy as jnp
import numpy as np
from jax.experimental import pallas as pl
from jax.experimental.pallas import tpu as pltpu

# ---------------- hyperparameters (small demo, module defaults where cheap) ----------------
ATOM_FDIM = 32        # stand-in for get_atom_fdim()
BOND_FDIM = 16        # stand-in for get_bond_fdim(atom_messages=True)
MP_HIDDEN = 128       # module default; lane-dense on TPU
MP_DEPTH = 3
N_ATOMS = 16          # atoms in each batched graph
N_BONDS = 24          # bonds in each batched graph
MAX_NB = 4            # max neighbors per atom
N_MOLS = 2            # molecules per batch (a_scope has 2 entries)

LANE = 128            # TPU lane width
F_ATOM_PAD = LANE     # atom feature dim zero-padded to 128 lanes
F_BOND_PAD = LANE     # bond feature dim zero-padded to 128 lanes
_BF16 = jnp.bfloat16  # MXU operand dtype (f32 accumulation everywhere)


# ------------------------------------ fused kernel ------------------------------------
def _double_mpnn_kernel(f_atoms_ref, f_bonds_ref, adj_aa_ref, adj_ab_ref,
                        memb_ref, inv_size_ref,
                        wi_ref, wh_msg_ref, wh_bond_ref,
                        wo_atom_ref, wo_msg_ref, bias_ref,
                        wf_ref, bf_ref, out_ref, *, mp_depth):
    """Single invocation: solute + solvent encoder chains side by side, then FFN head."""

    def encoder(e):
        # e is a static Python int (0 = solute, 1 = solvent) indexing the stacked axis.
        f_atoms = f_atoms_ref[e]                       # bf16 [N_atoms, F_ATOM_PAD]
        adj_aa = adj_aa_ref[e]                         # bf16 [N_atoms, N_atoms]
        biases = bias_ref[e]                           # f32  [3, H]  rows = (b_i, b_h, b_o)
        bi, bh, bo = biases[0:1], biases[1:2], biases[2:3]

        # ---------------- prologue: all loop-invariant MXU work ----------------
        # x = W_i(f_atoms); message = relu(x)
        x = jnp.dot(f_atoms, wi_ref[e], preferred_element_type=jnp.float32) + bi
        message = jnp.maximum(x, 0.0)                  # f32 on the VPU

        # Loop-invariant bond half of W_h, pre-fused with x and b_h:
        #   base = x + (sum_j f_bonds[a2b[i, j]]) @ W_h[H:, :] + b_h
        bond_sum = jnp.dot(adj_ab_ref[e], f_bonds_ref[e],
                           preferred_element_type=jnp.float32)
        bond_term = jnp.dot(bond_sum.astype(_BF16), wh_bond_ref[e],
                            preferred_element_type=jnp.float32)
        base = x + bond_term + bh

        # Loop-invariant atom half of W_o (+ b_o), hoisted off the serial tail.
        atom_part = jnp.dot(f_atoms, wo_atom_ref[e],
                            preferred_element_type=jnp.float32) + bo

        wh_msg = wh_msg_ref[e]                         # bf16 [H, H], loaded once
        # MP_DEPTH - 1 = 2 steps -> static Python loop is fine at this depth.
        for _ in range(mp_depth - 1):
            # sum_j message[a2a[i, j]]  (== index_select_ND(message, a2a).sum(dim=1))
            msg_sum = jnp.dot(adj_aa, message.astype(_BF16),
                              preferred_element_type=jnp.float32)
            lin = jnp.dot(msg_sum.astype(_BF16), wh_msg,
                          preferred_element_type=jnp.float32)
            message = jnp.maximum(base + lin, 0.0)     # dropout == identity (inference)

        # a_message = index_select_ND(message, a2a).sum(dim=1)
        a_message = jnp.dot(adj_aa, message.astype(_BF16),
                            preferred_element_type=jnp.float32)

        # atom_hiddens = relu(W_o(cat([f_atoms, a_message]))) with W_o split: only the
        # message half remains on the serial tail, no lane-axis concat copy.
        atom_hiddens = jnp.maximum(
            atom_part + jnp.dot(a_message.astype(_BF16), wo_msg_ref[e],
                                preferred_element_type=jnp.float32),
            0.0)

        # mean readout: exact bf16 0/1-membership matmul, then f32 1/a_size scale (VPU).
        # Empty molecules (a_size == 0) have all-zero membership rows -> zero vector,
        # matching chemprop's cached_zero_vector.
        mol_sum = jnp.dot(memb_ref[e], atom_hiddens.astype(_BF16),
                          preferred_element_type=jnp.float32)
        return mol_sum * inv_size_ref[e]               # f32 [N_MOLS, H]

    # Two independent dependency chains -> the scheduler interleaves their MXU pushes.
    mol_sol = encoder(0)
    mol_solv = encoder(1)

    # FFN head (Dropout==identity + Linear(2H, 1)) split at the concat boundary:
    #   out = mol_sol @ Wf[:H] + mol_solv @ Wf[H:] + bf
    # Weights/bias are lane-padded to 128 so the store is a lane-dense [N_MOLS, 128]
    # block; lane 0 holds the real output.
    out_ref[...] = (
        jnp.dot(mol_sol.astype(_BF16), wf_ref[0], preferred_element_type=jnp.float32)
        + jnp.dot(mol_solv.astype(_BF16), wf_ref[1], preferred_element_type=jnp.float32)
        + bf_ref[...])


# ------------------------------------ wrapper ------------------------------------
def double_mpnn_forward(sol_graph, solv_graph, params_sol, params_solv, ffn_params):
    """Single fused pallas_call, no grid: encoder(sol) || encoder(solv) -> FFN head."""
    def stack(a, b, dtype=jnp.float32):
        return jnp.stack([a, b], axis=0).astype(dtype)

    def pad_last(a, width):
        return jnp.pad(a, [(0, 0)] * (a.ndim - 1) + [(0, width - a.shape[-1])])

    def pad_rows(a, rows):
        return jnp.pad(a, [(0, rows - a.shape[0])] + [(0, 0)] * (a.ndim - 1))

    (fa_s, fb_s, aa_s, ab_s, mb_s, iv_s) = sol_graph
    (fa_v, fb_v, aa_v, ab_v, mb_v, iv_v) = solv_graph
    H = MP_HIDDEN

    # ---- graph tensors: stack encoders, zero-pad feature dims to 128 lanes, bf16 cast ----
    f_atoms = stack(pad_last(fa_s, F_ATOM_PAD), pad_last(fa_v, F_ATOM_PAD), _BF16)
    f_bonds = stack(pad_last(fb_s, F_BOND_PAD), pad_last(fb_v, F_BOND_PAD), _BF16)
    adj_aa = stack(aa_s, aa_v, _BF16)      # neighbor counts <= MAX_NB: exact in bf16
    adj_ab = stack(ab_s, ab_v, _BF16)
    memb = stack(mb_s, mb_v, _BF16)        # 0/1 membership: exact in bf16
    inv_size = stack(iv_s, iv_v)           # 1/a_size stays f32 (not bf16-representable)

    # ---- weights: split W_h and W_o at their cat boundaries, pad rows to padded dims ----
    def enc_weights(p):
        wi = pad_rows(p["Wi"], F_ATOM_PAD)                        # [F_ATOM_PAD, H]
        wh_msg = p["Wh"][:H]                                      # [H, H]
        wh_bond = pad_rows(p["Wh"][H:], F_BOND_PAD)               # [F_BOND_PAD, H]
        wo_atom = pad_rows(p["Wo"][:ATOM_FDIM], F_ATOM_PAD)       # [F_ATOM_PAD, H]
        wo_msg = p["Wo"][ATOM_FDIM:]                              # [H, H]
        biases = jnp.concatenate([p["bi"], p["bh"], p["bo"]], axis=0)   # [3, H]
        return wi, wh_msg, wh_bond, wo_atom, wo_msg, biases

    wi_s, whm_s, whb_s, woa_s, wom_s, b_s = enc_weights(params_sol)
    wi_v, whm_v, whb_v, woa_v, wom_v, b_v = enc_weights(params_solv)
    wi = stack(wi_s, wi_v, _BF16)
    wh_msg = stack(whm_s, whm_v, _BF16)
    wh_bond = stack(whb_s, whb_v, _BF16)
    wo_atom = stack(woa_s, woa_v, _BF16)
    wo_msg = stack(wom_s, wom_v, _BF16)
    biases = stack(b_s, b_v)                                      # f32 [2, 3, H]

    # FFN head split at the concat boundary; lane-padded so the output slab is lane-dense.
    wf = ffn_params["Wf"]                                         # [2H, 1]
    wf_split = stack(pad_last(wf[:H], LANE), pad_last(wf[H:], LANE), _BF16)  # [2, H, 128]
    bf = pad_last(ffn_params["bf"], LANE)                         # [1, 128] f32

    n_mols = mb_s.shape[0]
    vmem = pl.BlockSpec(memory_space=pltpu.MemorySpace.VMEM)      # whole array in VMEM

    out_pad = pl.pallas_call(
        functools.partial(_double_mpnn_kernel, mp_depth=MP_DEPTH),
        out_shape=jax.ShapeDtypeStruct((n_mols, LANE), jnp.float32),
        in_specs=[vmem] * 14,
        out_specs=vmem,
    )(f_atoms, f_bonds, adj_aa, adj_ab, memb, inv_size,
      wi, wh_msg, wh_bond, wo_atom, wo_msg, biases, wf_split, bf)

    return out_pad[:, :1]                            # [N_MOLS, 1]


# ------------------------- deterministic parameter init ----------------------
def init_linear(key, fan_in, fan_out):
    kw, kb = jax.random.split(key)
    bound = 1.0 / np.sqrt(fan_in)
    w = jax.random.uniform(kw, (fan_in, fan_out), jnp.float32, -bound, bound)
    b = jax.random.uniform(kb, (1, fan_out), jnp.float32, -bound, bound)
    return w, b


def init_mp_params(key):
    k1, k2, k3 = jax.random.split(key, 3)
    wi, bi = init_linear(k1, ATOM_FDIM, MP_HIDDEN)
    wh, bh = init_linear(k2, MP_HIDDEN + BOND_FDIM, MP_HIDDEN)   # W_h(cat(msg, f_bonds))
    wo, bo = init_linear(k3, ATOM_FDIM + MP_HIDDEN, MP_HIDDEN)   # W_o(cat(f_atoms, a_msg))
    return {"Wi": wi, "bi": bi, "Wh": wh, "bh": bh, "Wo": wo, "bo": bo}


def init_ffn_params(key):
    wf, bf = init_linear(key, 2 * MP_HIDDEN, 1)
    return {"Wf": wf, "bf": bf}


# --------------------------- synthetic graph builder -------------------------
def make_graph(key):
    kfa, kfb, kaa, kab = jax.random.split(key, 4)
    f_atoms = jax.random.normal(kfa, (N_ATOMS, ATOM_FDIM), jnp.float32)
    f_bonds = jax.random.normal(kfb, (N_BONDS, BOND_FDIM), jnp.float32)
    a2a = jax.random.randint(kaa, (N_ATOMS, MAX_NB), 0, N_ATOMS)
    a2b = jax.random.randint(kab, (N_ATOMS, MAX_NB), 0, N_BONDS)
    # adjacency (glue): A[i, j] = multiplicity of j among the neighbors of i
    adj_aa = jax.nn.one_hot(a2a, N_ATOMS, dtype=jnp.float32).sum(axis=1)
    adj_ab = jax.nn.one_hot(a2b, N_BONDS, dtype=jnp.float32).sum(axis=1)
    # a_scope = [(0, 8), (8, 8)] -> 0/1 membership matrix + f32 1/a_size scale.
    # max(a_size, 1) guard: an empty molecule has an all-zero membership row, so the
    # readout is the zero vector (chemprop cached_zero_vector), never 0/0.
    starts = jnp.array([0, 8])
    sizes = jnp.array([8, 8])
    idx = jnp.arange(N_ATOMS)
    memb = ((idx[None, :] >= starts[:, None])
            & (idx[None, :] < (starts + sizes)[:, None])).astype(jnp.float32)
    inv_size = (1.0 / jnp.maximum(sizes, 1).astype(jnp.float32))[:, None]   # [N_MOLS, 1]
    graph = (f_atoms, f_bonds, adj_aa, adj_ab, memb, inv_size)
    raw = (f_atoms, f_bonds, a2a, a2b, [(0, 8), (8, 8)])
    return graph, raw


# ----------------------------- pure-JAX f32 reference -----------------------------
def mp_encoder_ref(raw, params):
    f_atoms, f_bonds, a2a, a2b, a_scope = raw
    x = f_atoms @ params["Wi"] + params["bi"]
    message = jnp.maximum(x, 0.0)
    for _ in range(MP_DEPTH - 1):
        nei_a = message[a2a]                          # [N, max_nb, H]
        nei_b = f_bonds[a2b]                          # [N, max_nb, F_b]
        m = jnp.concatenate([nei_a, nei_b], axis=2).sum(axis=1)
        m = m @ params["Wh"] + params["bh"]
        message = jnp.maximum(x + m, 0.0)
    a_msg = message[a2a].sum(axis=1)
    a_in = jnp.concatenate([f_atoms, a_msg], axis=1)
    atom_h = jnp.maximum(a_in @ params["Wo"] + params["bo"], 0.0)
    # NOTE: the reference divides by sz directly; the kernel's max(sz, 1) guard only
    # differs in the (untested here) a_size == 0 case, by chemprop cached_zero_vector design.
    vecs = [atom_h[st:st + sz].sum(axis=0) / sz for (st, sz) in a_scope]
    return jnp.stack(vecs, axis=0)


def double_mpnn_ref(raw_sol, raw_solv, p_sol, p_solv, p_ffn):
    sol = mp_encoder_ref(raw_sol, p_sol)
    solv = mp_encoder_ref(raw_solv, p_solv)
    enc = jnp.concatenate([sol, solv], axis=1)
    return enc @ p_ffn["Wf"] + p_ffn["bf"]


# ----------------------------------- main ------------------------------------
if __name__ == "__main__":
    key = jax.random.PRNGKey(0)
    k_sol_g, k_solv_g, k_sol_p, k_solv_p, k_ffn = jax.random.split(key, 5)

    sol_graph, sol_raw = make_graph(k_sol_g)
    solv_graph, solv_raw = make_graph(k_solv_g)

    params_sol = init_mp_params(k_sol_p)
    params_solv = init_mp_params(k_solv_p)
    ffn_params = init_ffn_params(k_ffn)

    out = double_mpnn_forward(sol_graph, solv_graph, params_sol, params_solv, ffn_params)
    out = jax.block_until_ready(out)

    ref = double_mpnn_ref(sol_raw, solv_raw, params_sol, params_solv, ffn_params)
    ref = jax.block_until_ready(ref)

    assert out.shape == (N_MOLS, 1), out.shape
    # Tolerance covers the intentional bf16-operand / f32-accumulation MXU policy
    # measured against the strict f32 chemprop-semantics reference.
    np.testing.assert_allclose(np.asarray(out), np.asarray(ref), rtol=5e-2, atol=5e-2)
    print("KERNEL_OK")
</pallas_src>

<mosaic_0001>
module attributes {stable_mosaic.version = 11 : i64} {
  func.func @_double_mpnn_kernel(%arg0: memref<2x16x128xbf16, #tpu.memory_space<vmem>>, %arg1: memref<2x24x128xbf16, #tpu.memory_space<vmem>>, %arg2: memref<2x16x16xbf16, #tpu.memory_space<vmem>>, %arg3: memref<2x16x24xbf16, #tpu.memory_space<vmem>>, %arg4: memref<2x2x16xbf16, #tpu.memory_space<vmem>>, %arg5: memref<2x2x1xf32, #tpu.memory_space<vmem>>, %arg6: memref<2x128x128xbf16, #tpu.memory_space<vmem>>, %arg7: memref<2x128x128xbf16, #tpu.memory_space<vmem>>, %arg8: memref<2x128x128xbf16, #tpu.memory_space<vmem>>, %arg9: memref<2x128x128xbf16, #tpu.memory_space<vmem>>, %arg10: memref<2x128x128xbf16, #tpu.memory_space<vmem>>, %arg11: memref<2x3x128xf32, #tpu.memory_space<vmem>>, %arg12: memref<2x128x128xbf16, #tpu.memory_space<vmem>>, %arg13: memref<1x128xf32, #tpu.memory_space<vmem>>, %arg14: memref<2x128xf32, #tpu.memory_space<vmem>>) attributes {dimension_semantics = [], scalar_prefetch = 0 : i64, scratch_operands = 0 : i64, tpu.core_type = #tpu.core_type<tc>} {
    %c0 = arith.constant 0 : index
    %c0_0 = arith.constant 0 : index
    %c0_1 = arith.constant 0 : index
    %0 = vector.load %arg0[%c0, %c0_0, %c0_1] : memref<2x16x128xbf16, #tpu.memory_space<vmem>>, vector<1x16x128xbf16>
    %1 = vector.shape_cast %0 : vector<1x16x128xbf16> to vector<16x128xbf16>
    %c0_2 = arith.constant 0 : index
    %c0_3 = arith.constant 0 : index
    %c0_4 = arith.constant 0 : index
    %2 = vector.load %arg2[%c0_2, %c0_3, %c0_4] : memref<2x16x16xbf16, #tpu.memory_space<vmem>>, vector<1x16x16xbf16>
    %3 = vector.shape_cast %2 : vector<1x16x16xbf16> to vector<16x16xbf16>
    %c0_5 = arith.constant 0 : index
    %c0_6 = arith.constant 0 : index
    %c0_7 = arith.constant 0 : index
    %4 = vector.load %arg11[%c0_5, %c0_6, %c0_7] : memref<2x3x128xf32, #tpu.memory_space<vmem>>, vector<1x3x128xf32>
    %5 = vector.shape_cast %4 : vector<1x3x128xf32> to vector<3x128xf32>
    %6 = vector.extract_strided_slice %5 {offsets = [0, 0], sizes = [1, 128], strides = [1, 1]} : vector<3x128xf32> to vector<1x128xf32>
    %7 = vector.extract_strided_slice %5 {offsets = [1, 0], sizes = [1, 128], strides = [1, 1]} : vector<3x128xf32> to vector<1x128xf32>
    %8 = vector.extract_strided_slice %5 {offsets = [2, 0], sizes = [1, 128], strides = [1, 1]} : vector<3x128xf32> to vector<1x128xf32>
    %c0_8 = arith.constant 0 : index
    %c0_9 = arith.constant 0 : index
    %c0_10 = arith.constant 0 : index
    %9 = vector.load %arg6[%c0_8, %c0_9, %c0_10] : memref<2x128x128xbf16, #tpu.memory_space<vmem>>, vector<1x128x128xbf16>
    %10 = vector.shape_cast %9 : vector<1x128x128xbf16> to vector<128x128xbf16>
    %cst = arith.constant dense<0.000000e+00> : vector<16x128xf32>
    %11 = tpu.matmul %1, %10, %cst {dimension_numbers = #tpu.dot_dimension_numbers<[1], [0], [0], [1], [0, 0, 1, 1], [], []>} : vector<16x128xbf16>, vector<128x128xbf16>, vector<16x128xf32> -> vector<16x128xf32>
    %12 = vector.broadcast %6 : vector<1x128xf32> to vector<16x128xf32>
    %13 = arith.addf %11, %12 : vector<16x128xf32>
    %cst_11 = arith.constant 0.000000e+00 : f32
    %14 = vector.broadcast %cst_11 : f32 to vector<16x128xf32>
    %15 = arith.maximumf %13, %14 : vector<16x128xf32>
    %c0_12 = arith.constant 0 : index
    %c0_13 = arith.constant 0 : index
    %c0_14 = arith.constant 0 : index
    %16 = vector.load %arg3[%c0_12, %c0_13, %c0_14] : memref<2x16x24xbf16, #tpu.memory_space<vmem>>, vector<1x16x24xbf16>
    %17 = vector.shape_cast %16 : vector<1x16x24xbf16> to vector<16x24xbf16>
    %c0_15 = arith.constant 0 : index
    %c0_16 = arith.constant 0 : index
    %c0_17 = arith.constant 0 : index
    %18 = vector.load %arg1[%c0_15, %c0_16, %c0_17] : memref<2x24x128xbf16, #tpu.memory_space<vmem>>, vector<1x24x128xbf16>
    %19 = vector.shape_cast %18 : vector<1x24x128xbf16> to vector<24x128xbf16>
    %cst_18 = arith.constant dense<0.000000e+00> : vector<16x128xf32>
    %20 = tpu.matmul %17, %19, %cst_18 {dimension_numbers = #tpu.dot_dimension_numbers<[1], [0], [0], [1], [0, 0, 1, 1], [], []>} : vector<16x24xbf16>, vector<24x128xbf16>, vector<16x128xf32> -> vector<16x128xf32>
    %21 = arith.truncf %20 : vector<16x128xf32> to vector<16x128xbf16>
    %c0_19 = arith.constant 0 : index
    %c0_20 = arith.constant 0 : index
    %c0_21 = arith.constant 0 : index
    %22 = vector.load %arg8[%c0_19, %c0_20, %c0_21] : memref<2x128x128xbf16, #tpu.memory_space<vmem>>, vector<1x128x128xbf16>
    %23 = vector.shape_cast %22 : vector<1x128x128xbf16> to vector<128x128xbf16>
    %cst_22 = arith.constant dense<0.000000e+00> : vector<16x128xf32>
    %24 = tpu.matmul %21, %23, %cst_22 {dimension_numbers = #tpu.dot_dimension_numbers<[1], [0], [0], [1], [0, 0, 1, 1], [], []>} : vector<16x128xbf16>, vector<128x128xbf16>, vector<16x128xf32> -> vector<16x128xf32>
    %25 = arith.addf %13, %24 : vector<16x128xf32>
    %26 = vector.broadcast %7 : vector<1x128xf32> to vector<16x128xf32>
    %27 = arith.addf %25, %26 : vector<16x128xf32>
    %c0_23 = arith.constant 0 : index
    %c0_24 = arith.constant 0 : index
    %c0_25 = arith.constant 0 : index
    %28 = vector.load %arg9[%c0_23, %c0_24, %c0_25] : memref<2x128x128xbf16, #tpu.memory_space<vmem>>, vector<1x128x128xbf16>
    %29 = vector.shape_cast %28 : vector<1x128x128xbf16> to vector<128x128xbf16>
    %cst_26 = arith.constant dense<0.000000e+00> : vector<16x128xf32>
    %30 = tpu.matmul %1, %29, %cst_26 {dimension_numbers = #tpu.dot_dimension_numbers<[1], [0], [0], [1], [0, 0, 1, 1], [], []>} : vector<16x128xbf16>, vector<128x128xbf16>, vector<16x128xf32> -> vector<16x128xf32>
    %31 = vector.broadcast %8 : vector<1x128xf32> to vector<16x128xf32>
    %32 = arith.addf %30, %31 : vector<16x128xf32>
    %c0_27 = arith.constant 0 : index
    %c0_28 = arith.constant 0 : index
    %c0_29 = arith.constant 0 : index
    %33 = vector.load %arg7[%c0_27, %c0_28, %c0_29] : memref<2x128x128xbf16, #tpu.memory_space<vmem>>, vector<1x128x128xbf16>
    %34 = vector.shape_cast %33 : vector<1x128x128xbf16> to vector<128x128xbf16>
    %35 = arith.truncf %15 : vector<16x128xf32> to vector<16x128xbf16>
    %cst_30 = arith.constant dense<0.000000e+00> : vector<16x128xf32>
    %36 = tpu.matmul %3, %35, %cst_30 {dimension_numbers = #tpu.dot_dimension_numbers<[1], [0], [0], [1], [0, 0, 1, 1], [], []>} : vector<16x16xbf16>, vector<16x128xbf16>, vector<16x128xf32> -> vector<16x128xf32>
    %37 = arith.truncf %36 : vector<16x128xf32> to vector<16x128xbf16>
    %cst_31 = arith.constant dense<0.000000e+00> : vector<16x128xf32>
    %38 = tpu.matmul %37, %34, %cst_31 {dimension_numbers = #tpu.dot_dimension_numbers<[1], [0], [0], [1], [0, 0, 1, 1], [], []>} : vector<16x128xbf16>, vector<128x128xbf16>, vector<16x128xf32> -> vector<16x128xf32>
    %39 = arith.addf %27, %38 : vector<16x128xf32>
    %cst_32 = arith.constant 0.000000e+00 : f32
    %40 = vector.broadcast %cst_32 : f32 to vector<16x128xf32>
    %41 = arith.maximumf %39, %40 : vector<16x128xf32>
    %42 = arith.truncf %41 : vector<16x128xf32> to vector<16x128xbf16>
    %cst_33 = arith.constant dense<0.000000e+00> : vector<16x128xf32>
    %43 = tpu.matmul %3, %42, %cst_33 {dimension_numbers = #tpu.dot_dimension_numbers<[1], [0], [0], [1], [0, 0, 1, 1], [], []>} : vector<16x16xbf16>, vector<16x128xbf16>, vector<16x128xf32> -> vector<16x128xf32>
    %44 = arith.truncf %43 : vector<16x128xf32> to vector<16x128xbf16>
    %cst_34 = arith.constant dense<0.000000e+00> : vector<16x128xf32>
    %45 = tpu.matmul %44, %34, %cst_34 {dimension_numbers = #tpu.dot_dimension_numbers<[1], [0], [0], [1], [0, 0, 1, 1], [], []>} : vector<16x128xbf16>, vector<128x128xbf16>, vector<16x128xf32> -> vector<16x128xf32>
    %46 = arith.addf %27, %45 : vector<16x128xf32>
    %cst_35 = arith.constant 0.000000e+00 : f32
    %47 = vector.broadcast %cst_35 : f32 to vector<16x128xf32>
    %48 = arith.maximumf %46, %47 : vector<16x128xf32>
    %49 = arith.truncf %48 : vector<16x128xf32> to vector<16x128xbf16>
    %cst_36 = arith.constant dense<0.000000e+00> : vector<16x128xf32>
    %50 = tpu.matmul %3, %49, %cst_36 {dimension_numbers = #tpu.dot_dimension_numbers<[1], [0], [0], [1], [0, 0, 1, 1], [], []>} : vector<16x16xbf16>, vector<16x128xbf16>, vector<16x128xf32> -> vector<16x128xf32>
    %51 = arith.truncf %50 : vector<16x128xf32> to vector<16x128xbf16>
    %c0_37 = arith.constant 0 : index
    %c0_38 = arith.constant 0 : index
    %c0_39 = arith.constant 0 : index
    %52 = vector.load %arg10[%c0_37, %c0_38, %c0_39] : memref<2x128x128xbf16, #tpu.memory_space<vmem>>, vector<1x128x128xbf16>
    %53 = vector.shape_cast %52 : vector<1x128x128xbf16> to vector<128x128xbf16>
    %cst_40 = arith.constant dense<0.000000e+00> : vector<16x128xf32>
    %54 = tpu.matmul %51, %53, %cst_40 {dimension_numbers = #tpu.dot_dimension_numbers<[1], [0], [0], [1], [0, 0, 1, 1], [], []>} : vector<16x128xbf16>, vector<128x128xbf16>, vector<16x128xf32> -> vector<16x128xf32>
    %55 = arith.addf %32, %54 : vector<16x128xf32>
    %cst_41 = arith.constant 0.000000e+00 : f32
    %56 = vector.broadcast %cst_41 : f32 to vector<16x128xf32>
    %57 = arith.maximumf %55, %56 : vector<16x128xf32>
    %c0_42 = arith.constant 0 : index
    %c0_43 = arith.constant 0 : index
    %c0_44 = arith.constant 0 : index
    %58 = vector.load %arg4[%c0_42, %c0_43, %c0_44] : memref<2x2x16xbf16, #tpu.memory_space<vmem>>, vector<1x2x16xbf16>
    %59 = vector.shape_cast %58 : vector<1x2x16xbf16> to vector<2x16xbf16>
    %60 = arith.truncf %57 : vector<16x128xf32> to vector<16x128xbf16>
    %cst_45 = arith.constant dense<0.000000e+00> : vector<2x128xf32>
    %61 = tpu.matmul %59, %60, %cst_45 {dimension_numbers = #tpu.dot_dimension_numbers<[1], [0], [0], [1], [0, 0, 1, 1], [], []>} : vector<2x16xbf16>, vector<16x128xbf16>, vector<2x128xf32> -> vector<2x128xf32>
    %c0_46 = arith.constant 0 : index
    %c0_47 = arith.constant 0 : index
    %c0_48 = arith.constant 0 : index
    %62 = vector.load %arg5[%c0_46, %c0_47, %c0_48] : memref<2x2x1xf32, #tpu.memory_space<vmem>>, vector<1x2x1xf32>
    %63 = vector.shape_cast %62 : vector<1x2x1xf32> to vector<2x1xf32>
    %64 = vector.broadcast %63 : vector<2x1xf32> to vector<2x128xf32>
    %65 = arith.mulf %61, %64 : vector<2x128xf32>
    %c1 = arith.constant 1 : index
    %c0_49 = arith.constant 0 : index
    %c0_50 = arith.constant 0 : index
    %66 = vector.load %arg0[%c1, %c0_49, %c0_50] : memref<2x16x128xbf16, #tpu.memory_space<vmem>>, vector<1x16x128xbf16>
    %67 = vector.shape_cast %66 : vector<1x16x128xbf16> to vector<16x128xbf16>
    %c1_51 = arith.constant 1 : index
    %c0_52 = arith.constant 0 : index
    %c0_53 = arith.constant 0 : index
    %68 = vector.load %arg2[%c1_51, %c0_52, %c0_53] : memref<2x16x16xbf16, #tpu.memory_space<vmem>>, vector<1x16x16xbf16>
    %69 = vector.shape_cast %68 : vector<1x16x16xbf16> to vector<16x16xbf16>
    %c1_54 = arith.constant 1 : index
    %c0_55 = arith.constant 0 : index
    %c0_56 = arith.constant 0 : index
    %70 = vector.load %arg11[%c1_54, %c0_55, %c0_56] : memref<2x3x128xf32, #tpu.memory_space<vmem>>, vector<1x3x128xf32>
    %71 = vector.shape_cast %70 : vector<1x3x128xf32> to vector<3x128xf32>
    %72 = vector.extract_strided_slice %71 {offsets = [0, 0], sizes = [1, 128], strides = [1, 1]} : vector<3x128xf32> to vector<1x128xf32>
    %73 = vector.extract_strided_slice %71 {offsets = [1, 0], sizes = [1, 128], strides = [1, 1]} : vector<3x128xf32> to vector<1x128xf32>
    %74 = vector.extract_strided_slice %71 {offsets = [2, 0], sizes = [1, 128], strides = [1, 1]} : vector<3x128xf32> to vector<1x128xf32>
    %c1_57 = arith.constant 1 : index
    %c0_58 = arith.constant 0 : index
    %c0_59 = arith.constant 0 : index
    %75 = vector.load %arg6[%c1_57, %c0_58, %c0_59] : memref<2x128x128xbf16, #tpu.memory_space<vmem>>, vector<1x128x128xbf16>
    %76 = vector.shape_cast %75 : vector<1x128x128xbf16> to vector<128x128xbf16>
    %cst_60 = arith.constant dense<0.000000e+00> : vector<16x128xf32>
    %77 = tpu.matmul %67, %76, %cst_60 {dimension_numbers = #tpu.dot_dimension_numbers<[1], [0], [0], [1], [0, 0, 1, 1], [], []>} : vector<16x128xbf16>, vector<128x128xbf16>, vector<16x128xf32> -> vector<16x128xf32>
    %78 = vector.broadcast %72 : vector<1x128xf32> to vector<16x128xf32>
    %79 = arith.addf %77, %78 : vector<16x128xf32>
    %cst_61 = arith.constant 0.000000e+00 : f32
    %80 = vector.broadcast %cst_61 : f32 to vector<16x128xf32>
    %81 = arith.maximumf %79, %80 : vector<16x128xf32>
    %c1_62 = arith.constant 1 : index
    %c0_63 = arith.constant 0 : index
    %c0_64 = arith.constant 0 : index
    %82 = vector.load %arg3[%c1_62, %c0_63, %c0_64] : memref<2x16x24xbf16, #tpu.memory_space<vmem>>, vector<1x16x24xbf16>
    %83 = vector.shape_cast %82 : vector<1x16x24xbf16> to vector<16x24xbf16>
    %c1_65 = arith.constant 1 : index
    %c0_66 = arith.constant 0 : index
    %c0_67 = arith.constant 0 : index
    %84 = vector.load %arg1[%c1_65, %c0_66, %c0_67] : memref<2x24x128xbf16, #tpu.memory_space<vmem>>, vector<1x24x128xbf16>
    %85 = vector.shape_cast %84 : vector<1x24x128xbf16> to vector<24x128xbf16>
    %cst_68 = arith.constant dense<0.000000e+00> : vector<16x128xf32>
    %86 = tpu.matmul %83, %85, %cst_68 {dimension_numbers = #tpu.dot_dimension_numbers<[1], [0], [0], [1], [0, 0, 1, 1], [], []>} : vector<16x24xbf16>, vector<24x128xbf16>, vector<16x128xf32> -> vector<16x128xf32>
    %87 = arith.truncf %86 : vector<16x128xf32> to vector<16x128xbf16>
    %c1_69 = arith.constant 1 : index
    %c0_70 = arith.constant 0 : index
    %c0_71 = arith.constant 0 : index
    %88 = vector.load %arg8[%c1_69, %c0_70, %c0_71] : memref<2x128x128xbf16, #tpu.memory_space<vmem>>, vector<1x128x128xbf16>
    %89 = vector.shape_cast %88 : vector<1x128x128xbf16> to vector<128x128xbf16>
    %cst_72 = arith.constant dense<0.000000e+00> : vector<16x128xf32>
    %90 = tpu.matmul %87, %89, %cst_72 {dimension_numbers = #tpu.dot_dimension_numbers<[1], [0], [0], [1], [0, 0, 1, 1], [], []>} : vector<16x128xbf16>, vector<128x128xbf16>, vector<16x128xf32> -> vector<16x128xf32>
    %91 = arith.addf %79, %90 : vector<16x128xf32>
    %92 = vector.broadcast %73 : vector<1x128xf32> to vector<16x128xf32>
    %93 = arith.addf %91, %92 : vector<16x128xf32>
    %c1_73 = arith.constant 1 : index
    %c0_74 = arith.constant 0 : index
    %c0_75 = arith.constant 0 : index
    %94 = vector.load %arg9[%c1_73, %c0_74, %c0_75] : memref<2x128x128xbf16, #tpu.memory_space<vmem>>, vector<1x128x128xbf16>
    %95 = vector.shape_cast %94 : vector<1x128x128xbf16> to vector<128x128xbf16>
    %cst_76 = arith.constant dense<0.000000e+00> : vector<16x128xf32>
    %96 = tpu.matmul %67, %95, %cst_76 {dimension_numbers = #tpu.dot_dimension_numbers<[1], [0], [0], [1], [0, 0, 1, 1], [], []>} : vector<16x128xbf16>, vector<128x128xbf16>, vector<16x128xf32> -> vector<16x128xf32>
    %97 = vector.broadcast %74 : vector<1x128xf32> to vector<16x128xf32>
    %98 = arith.addf %96, %97 : vector<16x128xf32>
    %c1_77 = arith.constant 1 : index
    %c0_78 = arith.constant 0 : index
    %c0_79 = arith.constant 0 : index
    %99 = vector.load %arg7[%c1_77, %c0_78, %c0_79] : memref<2x128x128xbf16, #tpu.memory_space<vmem>>, vector<1x128x128xbf16>
    %100 = vector.shape_cast %99 : vector<1x128x128xbf16> to vector<128x128xbf16>
    %101 = arith.truncf %81 : vector<16x128xf32> to vector<16x128xbf16>
    %cst_80 = arith.constant dense<0.000000e+00> : vector<16x128xf32>
    %102 = tpu.matmul %69, %101, %cst_80 {dimension_numbers = #tpu.dot_dimension_numbers<[1], [0], [0], [1], [0, 0, 1, 1], [], []>} : vector<16x16xbf16>, vector<16x128xbf16>, vector<16x128xf32> -> vector<16x128xf32>
    %103 = arith.truncf %102 : vector<16x128xf32> to vector<16x128xbf16>
    %cst_81 = arith.constant dense<0.000000e+00> : vector<16x128xf32>
    %104 = tpu.matmul %103, %100, %cst_81 {dimension_numbers = #tpu.dot_dimension_numbers<[1], [0], [0], [1], [0, 0, 1, 1], [], []>} : vector<16x128xbf16>, vector<128x128xbf16>, vector<16x128xf32> -> vector<16x128xf32>
    %105 = arith.addf %93, %104 : vector<16x128xf32>
    %cst_82 = arith.constant 0.000000e+00 : f32
    %106 = vector.broadcast %cst_82 : f32 to vector<16x128xf32>
    %107 = arith.maximumf %105, %106 : vector<16x128xf32>
    %108 = arith.truncf %107 : vector<16x128xf32> to vector<16x128xbf16>
    %cst_83 = arith.constant dense<0.000000e+00> : vector<16x128xf32>
    %109 = tpu.matmul %69, %108, %cst_83 {dimension_numbers = #tpu.dot_dimension_numbers<[1], [0], [0], [1], [0, 0, 1, 1], [], []>} : vector<16x16xbf16>, vector<16x128xbf16>, vector<16x128xf32> -> vector<16x128xf32>
    %110 = arith.truncf %109 : vector<16x128xf32> to vector<16x128xbf16>
    %cst_84 = arith.constant dense<0.000000e+00> : vector<16x128xf32>
    %111 = tpu.matmul %110, %100, %cst_84 {dimension_numbers = #tpu.dot_dimension_numbers<[1], [0], [0], [1], [0, 0, 1, 1], [], []>} : vector<16x128xbf16>, vector<128x128xbf16>, vector<16x128xf32> -> vector<16x128xf32>
    %112 = arith.addf %93, %111 : vector<16x128xf32>
    %cst_85 = arith.constant 0.000000e+00 : f32
    %113 = vector.broadcast %cst_85 : f32 to vector<16x128xf32>
    %114 = arith.maximumf %112, %113 : vector<16x128xf32>
    %115 = arith.truncf %114 : vector<16x128xf32> to vector<16x128xbf16>
    %cst_86 = arith.constant dense<0.000000e+00> : vector<16x128xf32>
    %116 = tpu.matmul %69, %115, %cst_86 {dimension_numbers = #tpu.dot_dimension_numbers<[1], [0], [0], [1], [0, 0, 1, 1], [], []>} : vector<16x16xbf16>, vector<16x128xbf16>, vector<16x128xf32> -> vector<16x128xf32>
    %117 = arith.truncf %116 : vector<16x128xf32> to vector<16x128xbf16>
    %c1_87 = arith.constant 1 : index
    %c0_88 = arith.constant 0 : index
    %c0_89 = arith.constant 0 : index
    %118 = vector.load %arg10[%c1_87, %c0_88, %c0_89] : memref<2x128x128xbf16, #tpu.memory_space<vmem>>, vector<1x128x128xbf16>
    %119 = vector.shape_cast %118 : vector<1x128x128xbf16> to vector<128x128xbf16>
    %cst_90 = arith.constant dense<0.000000e+00> : vector<16x128xf32>
    %120 = tpu.matmul %117, %119, %cst_90 {dimension_numbers = #tpu.dot_dimension_numbers<[1], [0], [0], [1], [0, 0, 1, 1], [], []>} : vector<16x128xbf16>, vector<128x128xbf16>, vector<16x128xf32> -> vector<16x128xf32>
    %121 = arith.addf %98, %120 : vector<16x128xf32>
    %cst_91 = arith.constant 0.000000e+00 : f32
    %122 = vector.broadcast %cst_91 : f32 to vector<16x128xf32>
    %123 = arith.maximumf %121, %122 : vector<16x128xf32>
    %c1_92 = arith.constant 1 : index
    %c0_93 = arith.constant 0 : index
    %c0_94 = arith.constant 0 : index
    %124 = vector.load %arg4[%c1_92, %c0_93, %c0_94] : memref<2x2x16xbf16, #tpu.memory_space<vmem>>, vector<1x2x16xbf16>
    %125 = vector.shape_cast %124 : vector<1x2x16xbf16> to vector<2x16xbf16>
    %126 = arith.truncf %123 : vector<16x128xf32> to vector<16x128xbf16>
    %cst_95 = arith.constant dense<0.000000e+00> : vector<2x128xf32>
    %127 = tpu.matmul %125, %126, %cst_95 {dimension_numbers = #tpu.dot_dimension_numbers<[1], [0], [0], [1], [0, 0, 1, 1], [], []>} : vector<2x16xbf16>, vector<16x128xbf16>, vector<2x128xf32> -> vector<2x128xf32>
    %c1_96 = arith.constant 1 : index
    %c0_97 = arith.constant 0 : index
    %c0_98 = arith.constant 0 : index
    %128 = vector.load %arg5[%c1_96, %c0_97, %c0_98] : memref<2x2x1xf32, #tpu.memory_space<vmem>>, vector<1x2x1xf32>
    %129 = vector.shape_cast %128 : vector<1x2x1xf32> to vector<2x1xf32>
    %130 = vector.broadcast %129 : vector<2x1xf32> to vector<2x128xf32>
    %131 = arith.mulf %127, %130 : vector<2x128xf32>
    %132 = arith.truncf %65 : vector<2x128xf32> to vector<2x128xbf16>
    %c0_99 = arith.constant 0 : index
    %c0_100 = arith.constant 0 : index
    %c0_101 = arith.constant 0 : index
    %133 = vector.load %arg12[%c0_99, %c0_100, %c0_101] : memref<2x128x128xbf16, #tpu.memory_space<vmem>>, vector<1x128x128xbf16>
    %134 = vector.shape_cast %133 : vector<1x128x128xbf16> to vector<128x128xbf16>
    %cst_102 = arith.constant dense<0.000000e+00> : vector<2x128xf32>
    %135 = tpu.matmul %132, %134, %cst_102 {dimension_numbers = #tpu.dot_dimension_numbers<[1], [0], [0], [1], [0, 0, 1, 1], [], []>} : vector<2x128xbf16>, vector<128x128xbf16>, vector<2x128xf32> -> vector<2x128xf32>
    %136 = arith.truncf %131 : vector<2x128xf32> to vector<2x128xbf16>
    %c1_103 = arith.constant 1 : index
    %c0_104 = arith.constant 0 : index
    %c0_105 = arith.constant 0 : index
    %137 = vector.load %arg12[%c1_103, %c0_104, %c0_105] : memref<2x128x128xbf16, #tpu.memory_space<vmem>>, vector<1x128x128xbf16>
    %138 = vector.shape_cast %137 : vector<1x128x128xbf16> to vector<128x128xbf16>
    %cst_106 = arith.constant dense<0.000000e+00> : vector<2x128xf32>
    %139 = tpu.matmul %136, %138, %cst_106 {dimension_numbers = #tpu.dot_dimension_numbers<[1], [0], [0], [1], [0, 0, 1, 1], [], []>} : vector<2x128xbf16>, vector<128x128xbf16>, vector<2x128xf32> -> vector<2x128xf32>
    %140 = arith.addf %135, %139 : vector<2x128xf32>
    %c0_107 = arith.constant 0 : index
    %c0_108 = arith.constant 0 : index
    %141 = vector.load %arg13[%c0_107, %c0_108] : memref<1x128xf32, #tpu.memory_space<vmem>>, vector<1x128xf32>
    %142 = vector.broadcast %141 : vector<1x128xf32> to vector<2x128xf32>
    %143 = arith.addf %140, %142 : vector<2x128xf32>
    %c0_109 = arith.constant 0 : index
    %c0_110 = arith.constant 0 : index
    %144 = vector.load %arg14[%c0_109, %c0_110] : memref<2x128xf32, #tpu.memory_space<vmem>>, vector<2x128xf32>
    tpu.vector_store %arg14[%c0_109, %c0_110], %143 {strides = array<i32>} : memref<2x128xf32, #tpu.memory_space<vmem>>, vector<2x128xf32>,
    return
  }
}

</mosaic_0001>

<bundles_post_ra>
// kernel: tpu_custom_call.1
= control target key start
LH: loop header
LB: loop body
LE: loop exit
PB: predicated region body
PF: predicated region fallthrough
CT: control target
= control target key end

     0   :  { %19 = vsyncpa [#allocation3], 0  ;;  %s3715_s0 = inlined_call_operand.vmem [shape: bf16[2,16,128], index: 0, kind: input, shape index: {}]   ;;  %s3716_s1 = inlined_call_operand.hbm [shape: bf16[2,24,128], index: 1, kind: input, shape index: {}]   ;;  %s3717_s2 = inlined_call_operand.hbm [shape: bf16[2,16,16], index: 2, kind: input, shape index: {}]   ;;  %s3718_s3 = inlined_call_operand.hbm [shape: bf16[2,16,24], index: 3, kind: input, shape index: {}]   ;;  %s3719_s4 = inlined_call_operand.vmem [shape: bf16[2,2,16], index: 4, kind: input, shape index: {}]   ;;  %s3720_s5 = inlined_call_operand.vmem [shape: f32[2,2,1], index: 5, kind: input, shape index: {}]   ;;  %s3721_s6 = inlined_call_operand.hbm [shape: bf16[2,128,128], index: 6, kind: input, shape index: {}]   ;;  %s3722_s7 = inlined_call_operand.hbm [shape: bf16[2,128,128], index: 7, kind: input, shape index: {}]   ;;  %s3723_s8 = inlined_call_operand.hbm [shape: bf16[2,128,128], index: 8, kind: input, shape index: {}]   ;;  %s3724_s9 = inlined_call_operand.hbm [shape: bf16[2,128,128], index: 9, kind: input, shape index: {}]   ;;  %s3725_s10 = inlined_call_operand.hbm [shape: bf16[2,128,128], index: 10, kind: input, shape index: {}]   ;;  %s3726_s11 = inlined_call_operand.vmem [shape: f32[2,3,128], index: 11, kind: input, shape index: {}]   ;;  %s3727_s12 = inlined_call_operand.hbm [shape: bf16[2,128,128], index: 12, kind: input, shape index: {}]   ;;  %s3728_s13 = inlined_call_operand.vmem [shape: f32[1,128], index: 13, kind: input, shape index: {}]   ;;  %s3729_s14 = inlined_call_operand.hbm [shape: f32[2,128], index: 14, kind: output, shape index: {}]  }
   0x1   :  { %20 = vsyncpa [#allocation6], 0 }
   0x2   :  { %21 = vsyncpa [#allocation9], 0 }
   0x3   :  { %22 = vsyncpa [#allocation12], 0 }
   0x4   :  { %23 = vsyncpa [#allocation15], 0 }
   0x5   :  { %24 = vsyncpa [#allocation4], 0  ;;  %s3131_s29 = smov [#allocation5]   ;;  %s3132_s15 = smov [#allocation8]  }
   0x6   :  { %s44_s30 = sshll.u32 %s3131_s29, 4  ;;  %s72_s16 = sshll.u32 %s3132_s15, 4  ;;  %s45_s30 = int_to_ptr.vmem [resolvable:$true] %s44_s30  ;;  %s3221_s16 = int_to_ptr.vmem [resolvable:$true] %s72_s16 }
   0x7   :  { %s2899_s19 = scalar_lea.hbm %s3717_s2, 256 }
   0x8   :  { %p2900_p0 = scmp.ne.s32.totalorder %s3717_s2, %s2899_s19  ;;  %p2903_p1 = scmp.lt.u32.totalorder %s2899_s19, %s3717_s2 }
   0xa   :  { %p2905_p2 = pnand %p2903_p1, %p2900_p0 }
   0xc   :  { %2908 = shalt.err (!%p2905_p2)
}
   0xd   :  { %s2909_s24 = scalar_lea.vmem %s45_s30, 256  ;;  %p2914_p4 = scmp.lt.s32.totalorder %s45_s30, %s45_s30 }
   0xe   :  { %p2910_p3 = scmp.ne.s32.totalorder %s45_s30, %s2909_s24  ;;  %p2915_p5 = scmp.lt.s32.totalorder %s2909_s24, %s2909_s24 }
  0x10   :  { %p2916_p6 = por %p2915_p5, %p2914_p4 }
  0x12   :  { %p2917_p7 = pnand %p2916_p6, %p2910_p3 }
  0x14   :  { %2920 = shalt.err (!%p2917_p7)
}
  0x15   :  { %s3133_s25 = smov 64   ;;  %s3134_s26 = smov 4  }
  0x16   :  { %50 = dma.hbm_to_vmem [thread:$0]  %s3717_s2, 256, %s45_s30, [#allocation6], %s3133_s25, %s3133_s25, %s3134_s26  }
  0x17   :  { %s2921_s17 = scalar_lea.hbm %s3721_s6, 2048 }
  0x18   :  { %p2922_p8 = scmp.ne.s32.totalorder %s3721_s6, %s2921_s17  ;;  %p2925_p9 = scmp.lt.u32.totalorder %s2921_s17, %s3721_s6 }
  0x1a   :  { %p2927_p10 = pnand %p2925_p9, %p2922_p8 }
  0x1c   :  { %2930 = shalt.err (!%p2927_p10)
}
  0x1d   :  { %s2931_s22 = scalar_lea.vmem %s3221_s16, 2048  ;;  %p2936_p12 = scmp.lt.s32.totalorder %s3221_s16, %s3221_s16 }
  0x1e   :  { %p2932_p11 = scmp.ne.s32.totalorder %s3221_s16, %s2931_s22  ;;  %p2937_p13 = scmp.lt.s32.totalorder %s2931_s22, %s2931_s22 }
  0x20   :  { %p2938_p0 = por %p2937_p13, %p2936_p12 }
  0x22   :  { %p2939_p1 = pnand %p2938_p0, %p2932_p11 }
  0x24   :  { %2942 = shalt.err (!%p2939_p1)
}
  0x25   :  { %78 = dma.hbm_to_vmem [thread:$0]  %s3721_s6, 2048, %s3221_s16, [#allocation9], %s3133_s25, %s3133_s25, %s3134_s26  }
  0x26   :  { %s3135_s23 = smov [#allocation11]   ;;  %s3136_s27 = smov [#allocation14]  }
  0x27   :  { %s96_s24 = sshll.u32 %s3135_s23, 4  ;;  %s120_s28 = sshll.u32 %s3136_s27, 4  ;;  %s97_s24 = int_to_ptr.vmem [resolvable:$true] %s96_s24  ;;  %s3258_s28 = int_to_ptr.vmem [resolvable:$true] %s120_s28 }
  0x28   :  { %s2943_s17 = scalar_lea.hbm %s3723_s8, 2048 }
  0x29   :  { %p2944_p2 = scmp.ne.s32.totalorder %s3723_s8, %s2943_s17  ;;  %p2947_p3 = scmp.lt.u32.totalorder %s2943_s17, %s3723_s8 }
  0x2b   :  { %p2949_p4 = pnand %p2947_p3, %p2944_p2 }
  0x2d   :  { %2952 = shalt.err (!%p2949_p4)
}
  0x2e   :  { %s2953_s6 = scalar_lea.vmem %s97_s24, 2048  ;;  %p2958_p6 = scmp.lt.s32.totalorder %s97_s24, %s97_s24 }
  0x2f   :  { %p2954_p5 = scmp.ne.s32.totalorder %s97_s24, %s2953_s6  ;;  %p2959_p7 = scmp.lt.s32.totalorder %s2953_s6, %s2953_s6 }
  0x31   :  { %p2960_p8 = por %p2959_p7, %p2958_p6 }
  0x33   :  { %p2961_p9 = pnand %p2960_p8, %p2954_p5 }
  0x35   :  { %2964 = shalt.err (!%p2961_p9)
}
  0x36   :  { %102 = dma.hbm_to_vmem [thread:$0]  %s3723_s8, 2048, %s97_s24, [#allocation12], %s3133_s25, %s3133_s25, %s3134_s26  }
  0x37   :  { %s2965_s23 = scalar_lea.hbm %s3725_s10, 2048 }
  0x38   :  { %p2966_p10 = scmp.ne.s32.totalorder %s3725_s10, %s2965_s23  ;;  %p2969_p11 = scmp.lt.u32.totalorder %s2965_s23, %s3725_s10 }
  0x3a   :  { %p2971_p12 = pnand %p2969_p11, %p2966_p10 }
  0x3c   :  { %2974 = shalt.err (!%p2971_p12)
}
  0x3d   :  { %s2975_s18 = scalar_lea.vmem %s3258_s28, 2048  ;;  %p2980_p0 = scmp.lt.s32.totalorder %s3258_s28, %s3258_s28 }
  0x3e   :  { %p2976_p13 = scmp.ne.s32.totalorder %s3258_s28, %s2975_s18  ;;  %p2981_p1 = scmp.lt.s32.totalorder %s2975_s18, %s2975_s18 }
  0x40   :  { %p2982_p2 = por %p2981_p1, %p2980_p0 }
  0x42   :  { %p2983_p3 = pnand %p2982_p2, %p2976_p13 }
  0x44   :  { %2986 = shalt.err (!%p2983_p3)
}
  0x45   :  { %126 = dma.hbm_to_vmem [thread:$0]  %s3725_s10, 2048, %s3258_s28, [#allocation15], %s3133_s25, %s3133_s25, %s3134_s26  }
  0x46   :  { %s3137_s19 = smov [#allocation2]   ;;  %s3138_s21 = smov [#allocation7]  }
  0x47   :  { %s32_s20 = sshll.u32 %s3137_s19, 4  ;;  %s56_s6 = sshll.u32 %s3138_s21, 4  ;;  %s33_s20 = int_to_ptr.vmem [resolvable:$true] %s32_s20  ;;  %s3295_s6 = int_to_ptr.vmem [resolvable:$true] %s56_s6 }
  0x48   :  { %s2987_s2 = scalar_lea.hbm %s3716_s1, 384 }
  0x49   :  { %p2988_p4 = scmp.ne.s32.totalorder %s3716_s1, %s2987_s2  ;;  %p2991_p5 = scmp.lt.u32.totalorder %s2987_s2, %s3716_s1 }
  0x4b   :  { %p2993_p6 = pnand %p2991_p5, %p2988_p4 }
  0x4d   :  { %2996 = shalt.err (!%p2993_p6)
}
  0x4e   :  { %s2997_s10 = scalar_lea.vmem %s33_s20, 384  ;;  %p3002_p8 = scmp.lt.s32.totalorder %s33_s20, %s33_s20 }
  0x4f   :  { %p2998_p7 = scmp.ne.s32.totalorder %s33_s20, %s2997_s10  ;;  %p3003_p9 = scmp.lt.s32.totalorder %s2997_s10, %s2997_s10 }
  0x51   :  { %p3004_p10 = por %p3003_p9, %p3002_p8 }
  0x53   :  { %p3005_p11 = pnand %p3004_p10, %p2998_p7 }
  0x55   :  { %3008 = shalt.err (!%p3005_p11)
}
  0x56   :  { %38 = dma.hbm_to_vmem [thread:$0]  %s3716_s1, 384, %s33_s20, [#allocation3], %s3133_s25, %s3133_s25, %s3134_s26  }
  0x57   :  { %s3009_s8 = scalar_lea.hbm %s3718_s3, 256 }
  0x58   :  { %p3010_p12 = scmp.ne.s32.totalorder %s3718_s3, %s3009_s8  ;;  %p3013_p13 = scmp.lt.u32.totalorder %s3009_s8, %s3718_s3 }
  0x5a   :  { %p3015_p0 = pnand %p3013_p13, %p3010_p12 }
  0x5c   :  { %3018 = shalt.err (!%p3015_p0)
}
  0x5d   :  { %s3019_s22 = scalar_lea.vmem %s3295_s6, 256  ;;  %p3024_p2 = scmp.lt.s32.totalorder %s3295_s6, %s3295_s6 }
  0x5e   :  { %p3020_p1 = scmp.ne.s32.totalorder %s3295_s6, %s3019_s22  ;;  %p3025_p3 = scmp.lt.s32.totalorder %s3019_s22, %s3019_s22 }
  0x60   :  { %p3026_p4 = por %p3025_p3, %p3024_p2 }
  0x62   :  { %p3027_p5 = pnand %p3026_p4, %p3020_p1 }
  0x64   :  { %3030 = shalt.err (!%p3027_p5)
}
  0x65   :  { %62 = dma.hbm_to_vmem [thread:$0]  %s3718_s3, 256, %s3295_s6, [#allocation6], %s3133_s25, %s3133_s25, %s3134_s26  }
  0x66   :  { %s3139_s2 = smov [#allocation10]   ;;  %s3140_s23 = smov [#allocation13]  }
  0x67   :  { %s84_s30 = sshll.u32 %s3139_s2, 4  ;;  %s108_s27 = sshll.u32 %s3140_s23, 4  ;;  %s85_s30 = int_to_ptr.vmem [resolvable:$true] %s84_s30  ;;  %s3332_s27 = int_to_ptr.vmem [resolvable:$true] %s108_s27 }
  0x68   :  { %s3031_s28 = scalar_lea.hbm %s3722_s7, 2048 }
  0x69   :  { %p3032_p6 = scmp.ne.s32.totalorder %s3722_s7, %s3031_s28  ;;  %p3035_p7 = scmp.lt.u32.totalorder %s3031_s28, %s3722_s7 }
  0x6b   :  { %p3037_p8 = pnand %p3035_p7, %p3032_p6 }
  0x6d   :  { %3040 = shalt.err (!%p3037_p8)
}
  0x6e   :  { %s3041_s3 = scalar_lea.vmem %s85_s30, 2048  ;;  %p3046_p10 = scmp.lt.s32.totalorder %s85_s30, %s85_s30 }
  0x6f   :  { %p3042_p9 = scmp.ne.s32.totalorder %s85_s30, %s3041_s3  ;;  %p3047_p11 = scmp.lt.s32.totalorder %s3041_s3, %s3041_s3 }
  0x71   :  { %p3048_p12 = por %p3047_p11, %p3046_p10 }
  0x73   :  { %p3049_p13 = pnand %p3048_p12, %p3042_p9 }
  0x75   :  { %3052 = shalt.err (!%p3049_p13)
}
  0x76   :  { %90 = dma.hbm_to_vmem [thread:$0]  %s3722_s7, 2048, %s85_s30, [#allocation9], %s3133_s25, %s3133_s25, %s3134_s26  }
  0x77   :  { %s3053_s16 = scalar_lea.hbm %s3724_s9, 2048 }
  0x78   :  { %p3054_p0 = scmp.ne.s32.totalorder %s3724_s9, %s3053_s16  ;;  %p3057_p1 = scmp.lt.u32.totalorder %s3053_s16, %s3724_s9 }
  0x7a   :  { %p3059_p2 = pnand %p3057_p1, %p3054_p0 }
  0x7c   :  { %3062 = shalt.err (!%p3059_p2)
}
  0x7d   :  { %s3063_s23 = scalar_lea.vmem %s3332_s27, 2048  ;;  %p3068_p4 = scmp.lt.s32.totalorder %s3332_s27, %s3332_s27 }
  0x7e   :  { %p3064_p3 = scmp.ne.s32.totalorder %s3332_s27, %s3063_s23  ;;  %p3069_p5 = scmp.lt.s32.totalorder %s3063_s23, %s3063_s23 }
  0x80   :  { %p3070_p6 = por %p3069_p5, %p3068_p4 }
  0x82   :  { %p3071_p7 = pnand %p3070_p6, %p3064_p3 }
  0x84   :  { %3074 = shalt.err (!%p3071_p7)
}
  0x85   :  { %114 = dma.hbm_to_vmem [thread:$0]  %s3724_s9, 2048, %s3332_s27, [#allocation12], %s3133_s25, %s3133_s25, %s3134_s26  }
  0x86   :  { %s3141_s29 = smov [#allocation16]   ;;  %s3075_s17 = scalar_lea.hbm %s3727_s12, 2048 }
  0x87   :  { %s134_s10 = sshll.u32 %s3141_s29, 4  ;;  %p3076_p8 = scmp.ne.s32.totalorder %s3727_s12, %s3075_s17  ;;  %s135_s10 = int_to_ptr.vmem [resolvable:$true] %s134_s10 }
  0x88   :  { %p3079_p9 = scmp.lt.u32.totalorder %s3075_s17, %s3727_s12 }
  0x8a   :  { %p3081_p10 = pnand %p3079_p9, %p3076_p8 }
  0x8c   :  { %3084 = shalt.err (!%p3081_p10)
}
  0x8d   :  { %s3085_s24 = scalar_lea.vmem %s135_s10, 2048  ;;  %p3090_p12 = scmp.lt.s32.totalorder %s135_s10, %s135_s10 }
  0x8e   :  { %p3086_p11 = scmp.ne.s32.totalorder %s135_s10, %s3085_s24  ;;  %p3091_p13 = scmp.lt.s32.totalorder %s3085_s24, %s3085_s24 }
  0x90   :  { %p3092_p0 = por %p3091_p13, %p3090_p12 }
  0x92   :  { %p3093_p1 = pnand %p3092_p0, %p3086_p11 }
  0x94   :  { %3096 = shalt.err (!%p3093_p1)
}
  0x95   :  { %140 = dma.hbm_to_vmem [thread:$0]  %s3727_s12, 2048, %s135_s10, [#allocation15], %s3133_s25, %s3133_s25, %s3134_s26  }
  0x96   :  { %3119 = dma.done.wait [#allocation3], 384  }
  0x97   :  { %3120 = vsyncadd [#allocation3], 4294966912 }
  0x98   :  { %3121 = dma.done.wait [#allocation6], 512  }
  0x99   :  { %3122 = vsyncadd [#allocation6], 4294966784 }
  0x9a   :  { %3123 = dma.done.wait [#allocation9], 4096  }
  0x9b   :  { %3124 = vsyncadd [#allocation9], 4294963200 }
  0x9c   :  { %3125 = dma.done.wait [#allocation12], 4096  }
  0x9d   :  { %3126 = vsyncadd [#allocation12], 4294963200 }
  0x9e   :  { %3127 = dma.done.wait [#allocation15], 4096  }
  0x9f   :  { %3128 = vsyncadd [#allocation15], 4294963200  ;;  %v3142_v0 = vmov 0.0   ;;  %vm3143_vm0 = vmmov 0   ;;  %v2793_v1 = vld [vmem:[#allocation8] sm:$0xff]   ;;  %v2794_v2 = vld [vmem:[#allocation8 + $0x8] sm:$0xff]   ;;  %v192_v22 = vlaneseq }
  0xa0   :  { %2421 = vmatprep.subr.bf16.mxu0 %v3142_v0  ;;  %2437 = vmatprep.mubr.msk.bf16.mxu0 %vm3143_vm0, %v3142_v0  ;;  %v2795_v3 = vld [vmem:[#allocation8 + $0x10] sm:$0xff]   ;;  %v2796_v4 = vld [vmem:[#allocation8 + $0x18] sm:$0xff]   ;;  %v2805_v6 = vld [vmem:[#allocation11] sm:$0xff]   ;;  %vm316_vm1 = vcmask 1043456   ;;  %vm312_vm2 = vcmask 195584   ;;  %vm606_vm3 = vcmask 130048  }
  0xa1   :  { %2449 = vmatprep.subr.bf16.mxu1 %v3142_v0  ;;  %2465 = vmatprep.mubr.msk.bf16.mxu1 %vm3143_vm0, %v3142_v0  ;;  %v2803_v5 = vld [vmem:[#allocation2 + $0x8] ss:$0 sps:$4 sm:$0xff]   ;;  %v2797_v7 = vld [vmem:[#allocation8 + $0x20] sm:$0xff]   ;;  %v2806_v8 = vld [vmem:[#allocation11 + $0x8] sm:$0xff]   ;;  %v3420_v23 = vshrl.u32 %v192_v22, 7  ;;  %s3145_s10 = smov [#allocation17]  }
  0xa2   :  { %2422 = vmatpush3.bf16.msra.mxu0 %v2793_v1  ;;  %2450 = vmatpush3.bf16.msra.mxu1 %v2805_v6  ;;  %v2798_v9 = vld [vmem:[#allocation8 + $0x28] sm:$0xff]   ;;  %v318_v10 = vsel %vm316_vm1, %v2803_v5, 0  ;;  %v2807_v11 = vld [vmem:[#allocation11 + $0x10] sm:$0xff]   ;;  %v2808_v13 = vld [vmem:[#allocation11 + $0x18] sm:$0xff]   ;;  %s2138_s28 = sshll.u32 %s3145_s10, 4  ;;  %s2139_s28 = int_to_ptr.vmem [resolvable:$true] %s2138_s28 }
  0xa3   :  { %2423 = vmatprep.subr.bf16.mxu0 %v3142_v0  ;;  %2451 = vmatprep.subr.bf16.mxu1 %v3142_v0  ;;  %v2799_v12 = vld [vmem:[#allocation8 + $0x30] sm:$0xff]   ;;  %v2800_v14 = vld [vmem:[#allocation8 + $0x38] sm:$0xff]   ;;  %v2809_v15 = vld [vmem:[#allocation11 + $0x20] sm:$0xff]   ;;  %v194_v24 = vsub.s32 0, %v3420_v23  ;;  %s3097_s15 = scalar_lea.vmem %s2139_s28, 32  ;;  %p3102_p3 = scmp.lt.s32.totalorder %s2139_s28, %s2139_s28 }
  0xa4   :  { %v3404_v16 = vld [vmem:[%s3715_s0] sm:$0xff]   ;;  %v2804_v18 = vld [vmem:[#allocation7] sm:$0xff]   ;;  %v2812_v21 = vld [vmem:[#allocation11 + $0x38] sm:$0xff]   ;;  %p3098_p2 = scmp.ne.s32.totalorder %s2139_s28, %s3097_s15  ;;  %p3103_p4 = scmp.lt.s32.totalorder %s3097_s15, %s3097_s15 }
  0xa5   :  { %v2802_v17 = vld [vmem:[#allocation2] sm:$0xff]   ;;  %v2811_v20 = vld [vmem:[#allocation11 + $0x30] sm:$0xff]   ;;  %v3440_v41 = vld [vmem:[#allocation5] sm:$0xff]  }
  0xa6   :  { %2424 = vmatpush3.bf16.msra.mxu0 %v2794_v2  ;;  %2452 = vmatpush3.bf16.msra.mxu1 %v2806_v8  ;;  %v2810_v19 = vld [vmem:[#allocation11 + $0x28] sm:$0xff]   ;;  %v3442_v42 = vld [vmem:[#allocation10] sm:$0xff]   ;;  %v3453_v44 = vld [vmem:[#allocation10 + $0x10] sm:$0xff]   ;;  %p3104_p5 = por %p3103_p4, %p3102_p3 }
  0xa7   :  { %2425 = vmatprep.subr.bf16.mxu0 %v3142_v0  ;;  %2453 = vmatprep.subr.bf16.mxu1 %v3142_v0  ;;  %v3426_v25 = vld [vmem:[%s3726_s11] sm:$0x7]  ;;  %v3457_v45 = vld [vmem:[#allocation10 + $0x18] sm:$0xff]   ;;  %v3461_v46 = vld [vmem:[#allocation10 + $0x20] sm:$0xff]  }
  0xa8   :  { %v195_v28 = vrot.slane %v3426_v25, %v194_v24  ;;  %v3447_v43 = vld [vmem:[#allocation10 + $0x8] sm:$0xff]   ;;  %v3469_v48 = vld [vmem:[#allocation10 + $0x30] sm:$0xff]   ;;  %v3474_v49 = vld [vmem:[#allocation10 + $0x38] sm:$0xff]   ;;  %p3105_p6 = pnand %p3104_p5, %p3098_p2 }
  0xa9   :  { %v3466_v47 = vld [vmem:[#allocation10 + $0x28] sm:$0xff]   ;;  %v2822_v50 = vld [vmem:[#allocation13] sm:$0xff]   ;;  %v2824_v52 = vld [vmem:[#allocation13 + $0x10] sm:$0xff]  }
  0xaa   :  { %2426 = vmatpush3.bf16.msra.mxu0 %v2795_v3  ;;  %2454 = vmatpush3.bf16.msra.mxu1 %v2807_v11  ;;  %v2823_v51 = vld [vmem:[#allocation13 + $0x8] sm:$0xff]   ;;  %v2825_v53 = vld [vmem:[#allocation13 + $0x18] sm:$0xff]   ;;  %v2826_v54 = vld [vmem:[#allocation13 + $0x20] sm:$0xff]  }
  0xab   :  { %2427 = vmatprep.subr.bf16.mxu0 %v3142_v0  ;;  %2455 = vmatprep.subr.bf16.mxu1 %v3142_v0  ;;  %v2827_v55 = vld [vmem:[#allocation13 + $0x28] sm:$0xff]   ;;  %v2828_v56 = vld [vmem:[#allocation13 + $0x30] sm:$0xff]   ;;  %v2829_v3 = vld [vmem:[#allocation13 + $0x38] sm:$0xff]  }
  0xae   :  { %2428 = vmatpush3.bf16.msra.mxu0 %v2796_v4  ;;  %2456 = vmatpush3.bf16.msra.mxu1 %v2808_v13  ;;  %v471_v4 = vsub.s32 1, %v3420_v23 }
  0xaf   :  { %2429 = vmatprep.subr.bf16.mxu0 %v3142_v0  ;;  %2457 = vmatprep.subr.bf16.mxu1 %v3142_v0 }
  0xb0   :  { %v472_v6 = vrot.slane %v3426_v25, %v471_v4 }
  0xb2   :  { %2430 = vmatpush3.bf16.msra.mxu0 %v2797_v7  ;;  %2458 = vmatpush3.bf16.msra.mxu1 %v2809_v15 }
  0xb3   :  { %2431 = vmatprep.subr.bf16.mxu0 %v3142_v0  ;;  %2459 = vmatprep.subr.bf16.mxu1 %v3142_v0 }
  0xb6   :  { %2432 = vmatpush3.bf16.msra.mxu0 %v2798_v9  ;;  %2460 = vmatpush3.bf16.msra.mxu1 %v2810_v19 }
  0xb7   :  { %2433 = vmatprep.subr.bf16.mxu0 %v3142_v0  ;;  %2461 = vmatprep.subr.bf16.mxu1 %v3142_v0 }
  0xba   :  { %2434 = vmatpush3.bf16.msra.mxu0 %v2799_v12  ;;  %2462 = vmatpush3.bf16.msra.mxu1 %v2811_v20 }
  0xbb   :  { %2435 = vmatprep.subr.bf16.mxu0 %v3142_v0  ;;  %2463 = vmatprep.subr.bf16.mxu1 %v3142_v0 }
  0xbe   :  { %2436 = vmatpush3.bf16.msra.mxu0 %v2800_v14  ;;  %2464 = vmatpush3.bf16.msra.mxu1 %v2812_v21 }
  0xbf   :  { %2441 = vmatprep.subr.bf16.mxu0 %v3142_v0  ;;  %2489 = vmatprep.subr.bf16.mxu1 %v3142_v0 }
  0xc1   :  { %2438 = vmatmul.mubr.bf16.vlgmr.msra.gmra.mrb[0].mxu0 %v3404_v16 }
  0xc2   :  { %2442 = vmatpush3.bf16.msra.mxu0 %v2802_v17  ;;  %2445 = vmatprep.mubr.msk.bf16.mxu0 %vm3143_vm0, %v3142_v0 }
  0xc3   :  { %2443 = vmatprep.subr.bf16.mxu0 %v3142_v0 }
  0xc6   :  { %2444 = vmatpush3.bf16.msra.mxu0 %v318_v10 }
  0xc7   :  { %2469 = vmatprep.subr.bf16.mxu0 %v3142_v0 }
  0xc9   :  { %2446 = vmatmul.mubr.msk.bf16.vlgmr.msra.gmra.mrb[4].mxu0 %vm312_vm2, %v2804_v18 }
  0xca   :  { %2485 = vmatprep.mubr.msk.bf16.mxu0 %vm3143_vm0, %v3142_v0  ;;  %2470 = vmatpush3.bf16.msra.mxu0 %v2822_v50  ;;  %v3144_v50 = vmov 0  }
  0xcb   :  { %2471 = vmatprep.subr.bf16.mxu0 %v3142_v0  ;;  %2792 = vset.pattern.permute.xlu0 %v3144_v50 }
  0xce   :  { %2472 = vmatpush3.bf16.msra.mxu0 %v2823_v51  ;;  %v493_v51 = vsub.s32 2, %v3420_v23  ;;  %v2892_v23 = vld [vmem:[#allocation16 + $0x48] sm:$0xff]  }
  0xcf   :  { %2473 = vmatprep.subr.bf16.mxu0 %v3142_v0 }
  0xd2   :  { %2474 = vmatpush3.bf16.msra.mxu0 %v2824_v52  ;;  %v494_v52 = vrot.slane %v3426_v25, %v493_v51  ;;  %v2839_v25 = vld [vmem:[#allocation8 + $0x48] sm:$0xff]  }
  0xd3   :  { %2475 = vmatprep.subr.bf16.mxu0 %v3142_v0 }
  0xd6   :  { %2476 = vmatpush3.bf16.msra.mxu0 %v2825_v53 }
  0xd7   :  { %2477 = vmatprep.subr.bf16.mxu0 %v3142_v0 }
  0xda   :  { %2478 = vmatpush3.bf16.msra.mxu0 %v2826_v54 }
  0xdb   :  { %2479 = vmatprep.subr.bf16.mxu0 %v3142_v0 }
  0xde   :  { %2480 = vmatpush3.bf16.msra.mxu0 %v2827_v55 }
  0xdf   :  { %2481 = vmatprep.subr.bf16.mxu0 %v3142_v0 }
  0xe2   :  { %2482 = vmatpush3.bf16.msra.mxu0 %v2828_v56 }
  0xe3   :  { %2483 = vmatprep.subr.bf16.mxu0 %v3142_v0 }
  0xe6   :  { %2484 = vmatpush3.bf16.msra.mxu0 %v2829_v3  ;;  %v2842_v3 = vld [vmem:[#allocation8 + $0x60] sm:$0xff]  }
  0xe7   :  { %2515 = vmatprep.subr.bf16.mxu0 %v3142_v0 }
  0xe9   :  { %2486 = vmatmul.mubr.bf16.vlgmr.msra.gmra.mrb[8].mxu0 %v3404_v16 }
  0xea   :  { %2517 = vmatprep.mubr.msk.bf16.mxu0 %vm3143_vm0, %v3142_v0 }
 0x194   :  { %v284_v26 = vpop.f32.mrb[0].mxu0 }
 0x195   :  { %v2439_v27 = vpop.f32.mrb[1].mxu0  ;;  %v3433_v32 = vadd.f32 %v284_v26, %v195_v28 }
 0x196   :  { %v287_v29 = vpop.f32.mrb[2].mxu0  ;;  %v2830_v27 = vld [vmem:[#allocation14] sm:$0xff]  }
 0x197   :  { %v2440_v30 = vpop.f32.mrb[3].mxu0  ;;  %v3431_v31 = vadd.f32 %v287_v29, %v195_v28  ;;  %v291_v36 = vmax.f32 %v3433_v32, 0.0  ;;  %v2831_v28 = vld [vmem:[#allocation14 + $0x8] sm:$0xff]   ;;  %v2832_v29 = vld [vmem:[#allocation14 + $0x10] sm:$0xff]  }
 0x198   :  { %v2833_v30 = vld [vmem:[#allocation14 + $0x18] sm:$0xff]  }
 0x199   :  { %v292_v33 = vmax.f32 %v3431_v31, 0.0 }
 0x19b   :  { %v600_v40 = vpack.c.bf16 %v292_v33, %v291_v36  ;;  %v2836_v33 = vld [vmem:[#allocation14 + $0x30] sm:$0xff]  }
 0x19c   :  { %v354_v34 = vpop.f32.mrb[4].mxu0 }
 0x19d   :  { %v2447_v35 = vpop.f32.mrb[5].mxu0 }
 0x19e   :  { %v357_v37 = vpop.f32.mrb[6].mxu0 }
 0x19f   :  { %v361_v38 = vpack.c.bf16 %v357_v37, %v354_v34  ;;  %v2448_v39 = vpop.f32.mrb[7].mxu0 }
 0x1a1   :  { %2466 = vmatmul.mubr.bf16.vlgmr.msra.gmra.mrb[0].mxu1 %v361_v38 }
 0x1a2   :  { %2490 = vmatpush3.bf16.msra.mxu1 %v600_v40  ;;  %2491 = vmatprep.mubr.msk.bf16.mxu1 %vm3143_vm0, %v3142_v0 }
 0x1a3   :  { %2495 = vmatprep.subr.bf16.mxu1 %v3142_v0 }
 0x1a9   :  { %2492 = vmatmul.mubr.msk.bf16.vlgmr.msra.gmra.mrb[4].mxu1 %vm606_vm3, %v3440_v41 }
 0x1aa   :  { %2496 = vmatpush3.bf16.msra.mxu1 %v3442_v42  ;;  %2511 = vmatprep.mubr.msk.bf16.mxu1 %vm3143_vm0, %v3142_v0 }
 0x1ab   :  { %2497 = vmatprep.subr.bf16.mxu1 %v3142_v0 }
 0x1ae   :  { %2498 = vmatpush3.bf16.msra.mxu1 %v3447_v43 }
 0x1af   :  { %2499 = vmatprep.subr.bf16.mxu1 %v3142_v0 }
 0x1b2   :  { %2500 = vmatpush3.bf16.msra.mxu1 %v3453_v44 }
 0x1b3   :  { %2501 = vmatprep.subr.bf16.mxu1 %v3142_v0 }
 0x1b6   :  { %2502 = vmatpush3.bf16.msra.mxu1 %v3457_v45 }
 0x1b7   :  { %2503 = vmatprep.subr.bf16.mxu1 %v3142_v0 }
 0x1ba   :  { %2504 = vmatpush3.bf16.msra.mxu1 %v3461_v46 }
 0x1bb   :  { %2505 = vmatprep.subr.bf16.mxu1 %v3142_v0 }
 0x1be   :  { %2506 = vmatpush3.bf16.msra.mxu1 %v3466_v47 }
 0x1bf   :  { %2507 = vmatprep.subr.bf16.mxu1 %v3142_v0 }
 0x1c2   :  { %2508 = vmatpush3.bf16.msra.mxu1 %v3469_v48 }
 0x1c3   :  { %2509 = vmatprep.subr.bf16.mxu1 %v3142_v0 }
 0x1c6   :  { %2510 = vmatpush3.bf16.msra.mxu1 %v3474_v49 }
 0x1c7   :  { %2541 = vmatprep.subr.bf16.mxu1 %v3142_v0 }
 0x274   :  { %v460_v57 = vpop.f32.mrb[0].mxu1 }
 0x275   :  { %v2467_v58 = vpop.f32.mrb[1].mxu1  ;;  %v467_v5 = vadd.f32 %v460_v57, %v3433_v32  ;;  %v2835_v32 = vld [vmem:[#allocation14 + $0x28] sm:$0xff]  }
 0x276   :  { %v463_v59 = vpop.f32.mrb[2].mxu1 }
 0x277   :  { %v2468_v60 = vpop.f32.mrb[3].mxu1  ;;  %v468_v7 = vadd.f32 %v463_v59, %v3431_v31  ;;  %v473_v8 = vadd.f32 %v472_v6, %v467_v5  ;;  %v2834_v31 = vld [vmem:[#allocation14 + $0x20] sm:$0xff]   ;;  %v2843_v5 = vld [vmem:[#allocation8 + $0x68] sm:$0xff]  }
 0x279   :  { %v474_v12 = vadd.f32 %v472_v6, %v468_v7  ;;  %v2844_v6 = vld [vmem:[#allocation8 + $0x70] sm:$0xff]   ;;  %v2845_v7 = vld [vmem:[#allocation8 + $0x78] sm:$0xff]  }
 0x27c   :  { %v644_v61 = vpop.f32.mrb[4].mxu1 }
 0x27d   :  { %v2493_v62 = vpop.f32.mrb[5].mxu1 }
 0x27e   :  { %v647_v63 = vpop.f32.mrb[6].mxu1  ;;  %v985_v62 = vld [vmem:[%s3719_s4] sm:$0x1] }
 0x27f   :  { %v651_v1 = vpack.c.bf16 %v647_v63, %v644_v61  ;;  %v2494_v2 = vpop.f32.mrb[7].mxu1  ;;  %v2838_v63 = vld [vmem:[#allocation8 + $0x40] sm:$0xff]  }
 0x280   :  { %v2841_v2 = vld [vmem:[#allocation8 + $0x58] sm:$0xff]  }
 0x281   :  { %2512 = vmatmul.mubr.bf16.vlgmr.msra.gmra.mrb[8].mxu1 %v651_v1  ;;  %v2840_v1 = vld [vmem:[#allocation8 + $0x50] sm:$0xff]  }
 0x282   :  { %2543 = vmatprep.mubr.msk.bf16.mxu1 %vm3143_vm0, %v3142_v0 }
 0x354   :  { %v734_v9 = vpop.f32.mrb[8].mxu1 }
 0x355   :  { %v741_v10 = vadd.f32 %v734_v9, %v473_v8  ;;  %v2513_v11 = vpop.f32.mrb[9].mxu1  ;;  %v2847_v9 = vld [vmem:[#allocation2 + $0xc] sm:$0xff]  }
 0x356   :  { %v737_v13 = vpop.f32.mrb[10].mxu1 }
 0x357   :  { %v742_v14 = vadd.f32 %v737_v13, %v474_v12  ;;  %v2514_v15 = vpop.f32.mrb[11].mxu1  ;;  %v743_v16 = vmax.f32 %v741_v10, 0.0  ;;  %v2848_v10 = vld [vmem:[#allocation2 + $0x14] ss:$0 sps:$4 sm:$0xff]   ;;  %v2850_v13 = vld [vmem:[#allocation11 + $0x40] sm:$0xff]  }
 0x358   :  { %v1188_v11 = vsel %vm316_vm1, %v2848_v10, 0  ;;  %v2852_v15 = vld [vmem:[#allocation11 + $0x50] sm:$0xff]  }
 0x359   :  { %v744_v17 = vmax.f32 %v742_v14, 0.0  ;;  %v2851_v14 = vld [vmem:[#allocation11 + $0x48] sm:$0xff]  }
 0x35b   :  { %v745_v18 = vpack.c.bf16 %v744_v17, %v743_v16  ;;  %v2853_v16 = vld [vmem:[#allocation11 + $0x58] sm:$0xff]   ;;  %v2854_v17 = vld [vmem:[#allocation11 + $0x60] sm:$0xff]  }
 0x35d   :  { %2516 = vmatpush3.bf16.msra.mxu0 %v745_v18  ;;  %v2855_v18 = vld [vmem:[#allocation11 + $0x68] sm:$0xff]  }
 0x35e   :  { %2521 = vmatprep.subr.bf16.mxu0 %v3142_v0 }
 0x360   :  { %2518 = vmatmul.mubr.msk.bf16.vlgmr.msra.gmra.mrb[12].mxu0 %vm606_vm3, %v3440_v41 }
 0x361   :  { %2522 = vmatpush3.bf16.msra.mxu0 %v3442_v42  ;;  %2537 = vmatprep.mubr.msk.bf16.mxu0 %vm3143_vm0, %v3142_v0 }
 0x362   :  { %2523 = vmatprep.subr.bf16.mxu0 %v3142_v0 }
 0x365   :  { %2524 = vmatpush3.bf16.msra.mxu0 %v3447_v43 }
 0x366   :  { %2525 = vmatprep.subr.bf16.mxu0 %v3142_v0 }
 0x369   :  { %2526 = vmatpush3.bf16.msra.mxu0 %v3453_v44  ;;  %v2837_v44 = vld [vmem:[#allocation14 + $0x38] sm:$0xff]  }
 0x36a   :  { %2527 = vmatprep.subr.bf16.mxu0 %v3142_v0 }
 0x36d   :  { %2528 = vmatpush3.bf16.msra.mxu0 %v3457_v45 }
 0x36e   :  { %2529 = vmatprep.subr.bf16.mxu0 %v3142_v0 }
 0x371   :  { %2530 = vmatpush3.bf16.msra.mxu0 %v3461_v46 }
 0x372   :  { %2531 = vmatprep.subr.bf16.mxu0 %v3142_v0 }
 0x375   :  { %2532 = vmatpush3.bf16.msra.mxu0 %v3466_v47 }
 0x376   :  { %2533 = vmatprep.subr.bf16.mxu0 %v3142_v0 }
 0x379   :  { %2534 = vmatpush3.bf16.msra.mxu0 %v3469_v48 }
 0x37a   :  { %2535 = vmatprep.subr.bf16.mxu0 %v3142_v0 }
 0x37d   :  { %2536 = vmatpush3.bf16.msra.mxu0 %v3474_v49 }
 0x37e   :  { %2547 = vmatprep.subr.bf16.mxu0 %v3142_v0 }
 0x433   :  { %v780_v19 = vpop.f32.mrb[12].mxu0 }
 0x434   :  { %v2519_v20 = vpop.f32.mrb[13].mxu0 }
 0x435   :  { %v783_v21 = vpop.f32.mrb[14].mxu0  ;;  %v2857_v20 = vld [vmem:[#allocation11 + $0x78] sm:$0xff]  }
 0x436   :  { %v787_v22 = vpack.c.bf16 %v783_v21, %v780_v19  ;;  %v2520_v26 = vpop.f32.mrb[15].mxu0  ;;  %v2856_v19 = vld [vmem:[#allocation11 + $0x70] sm:$0xff]   ;;  %v2859_v21 = vld [vmem:[#allocation13 + $0x40] sm:$0xff]  }
 0x437   :  { %v2861_v26 = vld [vmem:[#allocation13 + $0x50] sm:$0xff]  }
 0x438   :  { %2538 = vmatmul.mubr.bf16.vlgmr.msra.gmra.mrb[16].mxu0 %v787_v22  ;;  %v2860_v22 = vld [vmem:[#allocation13 + $0x48] sm:$0xff]  }
 0x439   :  { %2563 = vmatprep.mubr.msk.bf16.mxu0 %vm3143_vm0, %v3142_v0  ;;  %2548 = vmatpush3.bf16.msra.mxu0 %v2830_v27  ;;  %v2862_v27 = vld [vmem:[#allocation13 + $0x58] sm:$0xff]  }
 0x43a   :  { %2549 = vmatprep.subr.bf16.mxu0 %v3142_v0 }
 0x43d   :  { %2550 = vmatpush3.bf16.msra.mxu0 %v2831_v28  ;;  %v2863_v28 = vld [vmem:[#allocation13 + $0x60] sm:$0xff]  }
 0x43e   :  { %2551 = vmatprep.subr.bf16.mxu0 %v3142_v0 }
 0x441   :  { %2552 = vmatpush3.bf16.msra.mxu0 %v2832_v29  ;;  %v2864_v29 = vld [vmem:[#allocation13 + $0x68] sm:$0xff]  }
 0x442   :  { %2553 = vmatprep.subr.bf16.mxu0 %v3142_v0 }
 0x445   :  { %2554 = vmatpush3.bf16.msra.mxu0 %v2833_v30  ;;  %v2865_v30 = vld [vmem:[#allocation13 + $0x70] sm:$0xff]  }
 0x446   :  { %2555 = vmatprep.subr.bf16.mxu0 %v3142_v0 }
 0x449   :  { %2556 = vmatpush3.bf16.msra.mxu0 %v2834_v31  ;;  %v2866_v31 = vld [vmem:[#allocation13 + $0x78] sm:$0xff]  }
 0x44a   :  { %2557 = vmatprep.subr.bf16.mxu0 %v3142_v0 }
 0x44d   :  { %2558 = vmatpush3.bf16.msra.mxu0 %v2835_v32  ;;  %v3586_v32 = vld [vmem:[#allocation10 + $0x40] sm:$0xff]  }
 0x44e   :  { %2559 = vmatprep.subr.bf16.mxu0 %v3142_v0 }
 0x451   :  { %2560 = vmatpush3.bf16.msra.mxu0 %v2836_v33  ;;  %v3591_v33 = vld [vmem:[#allocation10 + $0x48] sm:$0xff]  }
 0x452   :  { %2561 = vmatprep.subr.bf16.mxu0 %v3142_v0 }
 0x455   :  { %2562 = vmatpush3.bf16.msra.mxu0 %v2837_v44 }
 0x456   :  { %2601 = vmatprep.subr.bf16.mxu0 %v3142_v0 }
 0x50b   :  { %v822_v34 = vpop.f32.mrb[16].mxu0 }
 0x50c   :  { %v829_v35 = vadd.f32 %v822_v34, %v473_v8  ;;  %v2539_v36 = vpop.f32.mrb[17].mxu0  ;;  %v3559_v8 = vld [vmem:[%s3715_s0 + $0x8] sm:$0xff]  }
 0x50d   :  { %v825_v37 = vpop.f32.mrb[18].mxu0  ;;  %v3597_v34 = vld [vmem:[#allocation10 + $0x50] sm:$0xff]   ;;  %v3605_v36 = vld [vmem:[#allocation10 + $0x60] sm:$0xff]  }
 0x50e   :  { %v830_v38 = vadd.f32 %v825_v37, %v474_v12  ;;  %v2540_v39 = vpop.f32.mrb[19].mxu0  ;;  %v831_v40 = vmax.f32 %v829_v35, 0.0  ;;  %v2849_v12 = vld [vmem:[#allocation7 + $0x8] sm:$0xff]  }
 0x50f   :  { %v3601_v35 = vld [vmem:[#allocation10 + $0x58] sm:$0xff]  }
 0x510   :  { %v832_v42 = vmax.f32 %v830_v38, 0.0 }
 0x512   :  { %v833_v43 = vpack.c.bf16 %v832_v42, %v831_v40  ;;  %v3615_v42 = vld [vmem:[%s3726_s11 + $0x4] sm:$0x7] }
 0x514   :  { %2542 = vmatpush3.bf16.msra.mxu1 %v833_v43 }
 0x515   :  { %2567 = vmatprep.subr.bf16.mxu1 %v3142_v0 }
 0x517   :  { %2544 = vmatmul.mubr.msk.bf16.vlgmr.msra.gmra.mrb[12].mxu1 %vm606_vm3, %v3440_v41  ;;  %v1030_v41 = vld [vmem:[%s3720_s5] sm:$0x3] }
 0x518   :  { %2569 = vmatprep.mubr.msk.bf16.mxu1 %vm3143_vm0, %v3142_v0  ;;  %1033 = vperm.xlu0 %2792, %v1030_v41  }
 0x5ea   :  { %v868_v45 = vpop.f32.mrb[12].mxu1 }
 0x5eb   :  { %v2545_v46 = vpop.f32.mrb[13].mxu1 }
 0x5ec   :  { %v871_v47 = vpop.f32.mrb[14].mxu1 }
 0x5ed   :  { %v875_v48 = vpack.c.bf16 %v871_v47, %v868_v45  ;;  %v2546_v49 = vpop.f32.mrb[15].mxu1  ;;  %v1065_v45 = vrot.slane %v3615_v42, %v194_v24  ;;  %v3623_v24 = vld [vmem:[#allocation5 + $0x8] sm:$0xff]  }
 0x5ef   :  { %2564 = vmatmul.mubr.bf16.vlgmr.msra.gmra.mrb[8].mxu0 %v875_v48 }
 0x5f0   :  { %2617 = vmatprep.mubr.msk.bf16.mxu0 %vm3143_vm0, %v3142_v0  ;;  %2602 = vmatpush3.bf16.msra.mxu0 %v2850_v13 }
 0x5f1   :  { %2603 = vmatprep.subr.bf16.mxu0 %v3142_v0 }
 0x5f4   :  { %2604 = vmatpush3.bf16.msra.mxu0 %v2851_v14 }
 0x5f5   :  { %2605 = vmatprep.subr.bf16.mxu0 %v3142_v0 }
 0x5f8   :  { %2606 = vmatpush3.bf16.msra.mxu0 %v2852_v15 }
 0x5f9   :  { %2607 = vmatprep.subr.bf16.mxu0 %v3142_v0 }
 0x5fc   :  { %2608 = vmatpush3.bf16.msra.mxu0 %v2853_v16 }
 0x5fd   :  { %2609 = vmatprep.subr.bf16.mxu0 %v3142_v0 }
 0x600   :  { %2610 = vmatpush3.bf16.msra.mxu0 %v2854_v17 }
 0x601   :  { %2611 = vmatprep.subr.bf16.mxu0 %v3142_v0 }
 0x604   :  { %2612 = vmatpush3.bf16.msra.mxu0 %v2855_v18 }
 0x605   :  { %2613 = vmatprep.subr.bf16.mxu0 %v3142_v0 }
 0x608   :  { %2614 = vmatpush3.bf16.msra.mxu0 %v2856_v19 }
 0x609   :  { %2615 = vmatprep.subr.bf16.mxu0 %v3142_v0 }
 0x60c   :  { %2616 = vmatpush3.bf16.msra.mxu0 %v2857_v20 }
 0x60d   :  { %2641 = vmatprep.subr.bf16.mxu0 %v3142_v0 }
 0x6c2   :  { %v974_v53 = vpop.f32.mrb[8].mxu0 }
 0x6c3   :  { %v2765_v54 = vadd.f32 %v974_v53, %v494_v52  ;;  %v2565_v55 = vpop.f32.mrb[9].mxu0 }
 0x6c4   :  { %v977_v56 = vpop.f32.mrb[10].mxu0 }
 0x6c5   :  { %v2766_v57 = vadd.f32 %v977_v56, %v494_v52  ;;  %v2566_v58 = vpop.f32.mrb[11].mxu0  ;;  %v983_v59 = vmax.f32 %v2765_v54, 0.0 }
 0x6c6   :  { %v2872_v58 = vld [vmem:[#allocation10 + $0x68] sm:$0xff]  }
 0x6c7   :  { %v984_v60 = vmax.f32 %v2766_v57, 0.0 }
 0x6c9   :  { %v986_v61 = vpack.c.bf16 %v984_v60, %v983_v59  ;;  %v2873_v59 = vld [vmem:[#allocation10 + $0x70] sm:$0xff]   ;;  %v2874_v60 = vld [vmem:[#allocation10 + $0x78] sm:$0xff]  }
 0x6cb   :  { %2568 = vmatpush3.bf16.msra.mxu1 %v986_v61 }
 0x6cc   :  { %2573 = vmatprep.subr.bf16.mxu1 %v3142_v0 }
 0x6ce   :  { %2570 = vmatmul.mubr.msk.bf16.vlgmr.msra.gmra.mrb[16].mxu1 %vm606_vm3, %v985_v62 }
 0x6cf   :  { %2574 = vmatpush3.bf16.msra.mxu1 %v2838_v63  ;;  %2589 = vmatprep.mubr.msk.bf16.mxu1 %vm3143_vm0, %v3142_v0 }
 0x6d0   :  { %2575 = vmatprep.subr.bf16.mxu1 %v3142_v0 }
 0x6d3   :  { %2576 = vmatpush3.bf16.msra.mxu1 %v2839_v25 }
 0x6d4   :  { %2577 = vmatprep.subr.bf16.mxu1 %v3142_v0 }
 0x6d7   :  { %2578 = vmatpush3.bf16.msra.mxu1 %v2840_v1 }
 0x6d8   :  { %2579 = vmatprep.subr.bf16.mxu1 %v3142_v0 }
 0x6db   :  { %2580 = vmatpush3.bf16.msra.mxu1 %v2841_v2 }
 0x6dc   :  { %2581 = vmatprep.subr.bf16.mxu1 %v3142_v0 }
 0x6df   :  { %2582 = vmatpush3.bf16.msra.mxu1 %v2842_v3 }
 0x6e0   :  { %2583 = vmatprep.subr.bf16.mxu1 %v3142_v0 }
 0x6e3   :  { %2584 = vmatpush3.bf16.msra.mxu1 %v2843_v5 }
 0x6e4   :  { %2585 = vmatprep.subr.bf16.mxu1 %v3142_v0 }
 0x6e7   :  { %2586 = vmatpush3.bf16.msra.mxu1 %v2844_v6 }
 0x6e8   :  { %2587 = vmatprep.subr.bf16.mxu1 %v3142_v0 }
 0x6eb   :  { %2588 = vmatpush3.bf16.msra.mxu1 %v2845_v7 }
 0x6ec   :  { %2593 = vmatprep.subr.bf16.mxu1 %v3142_v0 }
 0x6ee   :  { %2590 = vmatmul.mubr.bf16.vlgmr.msra.gmra.mrb[20].mxu1 %v3559_v8 }
 0x6ef   :  { %2594 = vmatpush3.bf16.msra.mxu1 %v2847_v9  ;;  %2597 = vmatprep.mubr.msk.bf16.mxu1 %vm3143_vm0, %v3142_v0 }
 0x6f0   :  { %2595 = vmatprep.subr.bf16.mxu1 %v3142_v0 }
 0x6f3   :  { %2596 = vmatpush3.bf16.msra.mxu1 %v1188_v11 }
 0x6f4   :  { %2621 = vmatprep.subr.bf16.mxu1 %v3142_v0 }
 0x6f6   :  { %2598 = vmatmul.mubr.msk.bf16.vlgmr.msra.gmra.mrb[24].mxu1 %vm312_vm2, %v2849_v12 }
 0x6f7   :  { %2637 = vmatprep.mubr.msk.bf16.mxu1 %vm3143_vm0, %v3142_v0  ;;  %2622 = vmatpush3.bf16.msra.mxu1 %v2859_v21 }
 0x6f8   :  { %2623 = vmatprep.subr.bf16.mxu1 %v3142_v0 }
 0x6fb   :  { %2624 = vmatpush3.bf16.msra.mxu1 %v2860_v22 }
 0x6fc   :  { %2625 = vmatprep.subr.bf16.mxu1 %v3142_v0 }
 0x6ff   :  { %2626 = vmatpush3.bf16.msra.mxu1 %v2861_v26 }
 0x700   :  { %2627 = vmatprep.subr.bf16.mxu1 %v3142_v0 }
 0x703   :  { %2628 = vmatpush3.bf16.msra.mxu1 %v2862_v27 }
 0x704   :  { %2629 = vmatprep.subr.bf16.mxu1 %v3142_v0 }
 0x707   :  { %2630 = vmatpush3.bf16.msra.mxu1 %v2863_v28 }
 0x708   :  { %2631 = vmatprep.subr.bf16.mxu1 %v3142_v0 }
 0x70b   :  { %2632 = vmatpush3.bf16.msra.mxu1 %v2864_v29 }
 0x70c   :  { %2633 = vmatprep.subr.bf16.mxu1 %v3142_v0 }
 0x70f   :  { %2634 = vmatpush3.bf16.msra.mxu1 %v2865_v30 }
 0x710   :  { %2635 = vmatprep.subr.bf16.mxu1 %v3142_v0 }
 0x713   :  { %2636 = vmatpush3.bf16.msra.mxu1 %v2866_v31 }
 0x714   :  { %2647 = vmatprep.subr.bf16.mxu1 %v3142_v0 }
 0x716   :  { %2638 = vmatmul.mubr.bf16.vlgmr.msra.gmra.mrb[28].mxu1 %v3559_v8  ;;  %v1343_v8 = vrot.slane %v3615_v42, %v471_v4 }
 0x717   :  { %2648 = vmatpush3.bf16.msra.mxu1 %v3586_v32  ;;  %2663 = vmatprep.mubr.msk.bf16.mxu1 %vm3143_vm0, %v3142_v0 }
 0x718   :  { %2649 = vmatprep.subr.bf16.mxu1 %v3142_v0 }
 0x71b   :  { %2650 = vmatpush3.bf16.msra.mxu1 %v3591_v33 }
 0x71c   :  { %2651 = vmatprep.subr.bf16.mxu1 %v3142_v0 }
 0x71f   :  { %2652 = vmatpush3.bf16.msra.mxu1 %v3597_v34 }
 0x720   :  { %2653 = vmatprep.subr.bf16.mxu1 %v3142_v0 }
 0x723   :  { %2654 = vmatpush3.bf16.msra.mxu1 %v3601_v35 }
 0x724   :  { %2655 = vmatprep.subr.bf16.mxu1 %v3142_v0 }
 0x727   :  { %2656 = vmatpush3.bf16.msra.mxu1 %v3605_v36 }
 0x728   :  { %2657 = vmatprep.subr.bf16.mxu1 %v3142_v0 }
 0x72b   :  { %2658 = vmatpush3.bf16.msra.mxu1 %v2872_v58 }
 0x72c   :  { %2659 = vmatprep.subr.bf16.mxu1 %v3142_v0 }
 0x72f   :  { %2660 = vmatpush3.bf16.msra.mxu1 %v2873_v59 }
 0x730   :  { %2661 = vmatprep.subr.bf16.mxu1 %v3142_v0 }
 0x733   :  { %2662 = vmatpush3.bf16.msra.mxu1 %v2874_v60 }
 0x734   :  { %2693 = vmatprep.subr.bf16.mxu1 %v3142_v0 }
 0x7a1   :  { %v3610_v37 = vpop.f32.mrb[16].mxu1 }
 0x7a2   :  { %v2571_v38 = vpop.f32.mrb[17].mxu1 }
 0x7a3   :  { %v1027_v39 = vpop.f32.mrb[18].mxu1  ;;  %v2875_v38 = vld [vmem:[#allocation14 + $0x40] sm:$0xff]  }
 0x7a4   :  { %v2572_v40 = vpop.f32.mrb[19].mxu1  ;;  %v2876_v39 = vld [vmem:[#allocation14 + $0x48] sm:$0xff]  }
 0x7a5   :  { %v2877_v40 = vld [vmem:[#allocation14 + $0x50] sm:$0xff]  }
 0x7c1   :  { %v1154_v43 = vpop.f32.mrb[20].mxu1 }
 0x7c2   :  { %v2591_v44 = vpop.f32.mrb[21].mxu1  ;;  %v1155_v49 = vadd.f32 %v1154_v43, %v1065_v45  ;;  %v2878_v43 = vld [vmem:[#allocation14 + $0x58] sm:$0xff]  }
 0x7c3   :  { %v1157_v46 = vpop.f32.mrb[22].mxu1  ;;  %v2879_v44 = vld [vmem:[#allocation14 + $0x60] sm:$0xff]  }
 0x7c4   :  { %v2592_v47 = vpop.f32.mrb[23].mxu1  ;;  %v1158_v48 = vadd.f32 %v1157_v46, %v1065_v45  ;;  %v1161_v53 = vmax.f32 %v1155_v49, 0.0  ;;  %v2880_v45 = vld [vmem:[#allocation14 + $0x68] sm:$0xff]   ;;  %v2881_v46 = vld [vmem:[#allocation14 + $0x70] sm:$0xff]  }
 0x7c5   :  { %v2882_v47 = vld [vmem:[#allocation14 + $0x78] sm:$0xff]  }
 0x7c6   :  { %v1162_v41 = vmax.f32 %v1158_v48, 0.0 }
 0x7c8   :  { %v1473_v57 = vpack.c.bf16 %v1162_v41, %v1161_v53 }
 0x7c9   :  { %v1224_v50 = vpop.f32.mrb[24].mxu1 }
 0x7ca   :  { %v2599_v52 = vpop.f32.mrb[25].mxu1 }
 0x7cb   :  { %v1227_v54 = vpop.f32.mrb[26].mxu1 }
 0x7cc   :  { %v1231_v55 = vpack.c.bf16 %v1227_v54, %v1224_v50  ;;  %v2600_v56 = vpop.f32.mrb[27].mxu1  ;;  %v2883_v50 = vld [vmem:[#allocation16] sm:$0xff]   ;;  %v2884_v54 = vld [vmem:[#allocation16 + $0x8] sm:$0xff]  }
 0x7cd   :  { %v2886_v56 = vld [vmem:[#allocation16 + $0x18] sm:$0xff]  }
 0x7ce   :  { %2618 = vmatmul.mubr.bf16.vlgmr.msra.gmra.mrb[20].mxu0 %v1231_v55  ;;  %v2885_v55 = vld [vmem:[#allocation16 + $0x10] sm:$0xff]  }
 0x7cf   :  { %2642 = vmatpush3.bf16.msra.mxu0 %v1473_v57  ;;  %2643 = vmatprep.mubr.msk.bf16.mxu0 %vm3143_vm0, %v3142_v0  ;;  %v2887_v57 = vld [vmem:[#allocation16 + $0x20] sm:$0xff]  }
 0x7d0   :  { %2667 = vmatprep.subr.bf16.mxu0 %v3142_v0 }
 0x7d6   :  { %2644 = vmatmul.mubr.msk.bf16.vlgmr.msra.gmra.mrb[24].mxu0 %vm606_vm3, %v3623_v24 }
 0x7d7   :  { %2669 = vmatprep.mubr.msk.bf16.mxu0 %vm3143_vm0, %v3142_v0 }
 0x8a1   :  { %v1331_v61 = vpop.f32.mrb[20].mxu0 }
 0x8a2   :  { %v2619_v62 = vpop.f32.mrb[21].mxu0  ;;  %v1338_v7 = vadd.f32 %v1331_v61, %v1155_v49 }
 0x8a3   :  { %v1334_v63 = vpop.f32.mrb[22].mxu0 }
 0x8a4   :  { %v2620_v25 = vpop.f32.mrb[23].mxu0  ;;  %v1339_v9 = vadd.f32 %v1334_v63, %v1158_v48  ;;  %v1344_v10 = vadd.f32 %v1343_v8, %v1338_v7  ;;  %v2255_v63 = vld [vmem:[%s3720_s5 + $0x2] sm:$0x3] }
 0x8a5   :  { %1908 = vperm.xlu0 %2792, %v2255_v63   ;;  %v1366_v25 = vrot.slane %v3615_v42, %v493_v51  ;;  %v2893_v51 = vld [vmem:[#allocation16 + $0x50] sm:$0xff]   ;;  %v2894_v42 = vld [vmem:[#allocation16 + $0x58] sm:$0xff]  }
 0x8a6   :  { %v1345_v14 = vadd.f32 %v1343_v8, %v1339_v9 }
 0x8a9   :  { %v1516_v1 = vpop.f32.mrb[24].mxu0 }
 0x8aa   :  { %v2645_v2 = vpop.f32.mrb[25].mxu0 }
 0x8ab   :  { %v1519_v3 = vpop.f32.mrb[26].mxu0 }
 0x8ac   :  { %v1523_v5 = vpack.c.bf16 %v1519_v3, %v1516_v1  ;;  %v2646_v6 = vpop.f32.mrb[27].mxu0 }
 0x8ae   :  { %2664 = vmatmul.mubr.bf16.vlgmr.msra.gmra.mrb[32].mxu1 %v1523_v5 }
 0x8af   :  { %2695 = vmatprep.mubr.msk.bf16.mxu1 %vm3143_vm0, %v3142_v0 }
 0x981   :  { %v1606_v11 = vpop.f32.mrb[32].mxu1 }
 0x982   :  { %v1613_v12 = vadd.f32 %v1606_v11, %v1344_v10  ;;  %v2665_v13 = vpop.f32.mrb[33].mxu1  ;;  %v2891_v11 = vld [vmem:[#allocation16 + $0x40] sm:$0xff]  }
 0x983   :  { %v1609_v15 = vpop.f32.mrb[34].mxu1  ;;  %v2896_v13 = vld [vmem:[#allocation16 + $0x68] sm:$0xff]  }
 0x984   :  { %v1614_v16 = vadd.f32 %v1609_v15, %v1345_v14  ;;  %v2666_v17 = vpop.f32.mrb[35].mxu1  ;;  %v1615_v18 = vmax.f32 %v1613_v12, 0.0  ;;  %v2895_v12 = vld [vmem:[#allocation16 + $0x60] sm:$0xff]  }
 0x986   :  { %v1616_v19 = vmax.f32 %v1614_v16, 0.0  ;;  %v2897_v16 = vld [vmem:[#allocation16 + $0x70] sm:$0xff]  }
 0x988   :  { %v1617_v20 = vpack.c.bf16 %v1616_v19, %v1615_v18  ;;  %v2898_v19 = vld [vmem:[#allocation16 + $0x78] sm:$0xff]  }
 0x98a   :  { %2668 = vmatpush3.bf16.msra.mxu0 %v1617_v20 }
 0x98b   :  { %2673 = vmatprep.subr.bf16.mxu0 %v3142_v0 }
 0x98d   :  { %2670 = vmatmul.mubr.msk.bf16.vlgmr.msra.gmra.mrb[28].mxu0 %vm606_vm3, %v3623_v24 }
 0x98e   :  { %2674 = vmatpush3.bf16.msra.mxu0 %v3586_v32  ;;  %2689 = vmatprep.mubr.msk.bf16.mxu0 %vm3143_vm0, %v3142_v0 }
 0x98f   :  { %2675 = vmatprep.subr.bf16.mxu0 %v3142_v0 }
 0x992   :  { %2676 = vmatpush3.bf16.msra.mxu0 %v3591_v33 }
 0x993   :  { %2677 = vmatprep.subr.bf16.mxu0 %v3142_v0 }
 0x996   :  { %2678 = vmatpush3.bf16.msra.mxu0 %v3597_v34 }
 0x997   :  { %2679 = vmatprep.subr.bf16.mxu0 %v3142_v0 }
 0x99a   :  { %2680 = vmatpush3.bf16.msra.mxu0 %v3601_v35 }
 0x99b   :  { %2681 = vmatprep.subr.bf16.mxu0 %v3142_v0 }
 0x99e   :  { %2682 = vmatpush3.bf16.msra.mxu0 %v3605_v36 }
 0x99f   :  { %2683 = vmatprep.subr.bf16.mxu0 %v3142_v0 }
 0x9a2   :  { %2684 = vmatpush3.bf16.msra.mxu0 %v2872_v58  ;;  %v2889_v58 = vld [vmem:[#allocation16 + $0x30] sm:$0xff]  }
 0x9a3   :  { %2685 = vmatprep.subr.bf16.mxu0 %v3142_v0 }
 0x9a6   :  { %2686 = vmatpush3.bf16.msra.mxu0 %v2873_v59  ;;  %v1034_v59 = vpop.permute.xlu0 %1033 }
 0x9a7   :  { %2687 = vmatprep.subr.bf16.mxu0 %v3142_v0  ;;  %v1036_v61 = vmul.f32 %v1034_v59, %v3610_v37 }
 0x9a9   :  { %v1912_v62 = vpack.c.bf16 %v1036_v61, %v1036_v61 }
 0x9aa   :  { %2688 = vmatpush3.bf16.msra.mxu0 %v2874_v60  ;;  %v2890_v60 = vld [vmem:[#allocation16 + $0x38] sm:$0xff]   ;;  %v1909_v20 = vpop.permute.xlu0 %1908 }
 0x9ab   :  { %2719 = vmatprep.subr.bf16.mxu0 %v3142_v0 }
 0xa60   :  { %v1652_v4 = vpop.f32.mrb[28].mxu0 }
 0xa61   :  { %v2671_v21 = vpop.f32.mrb[29].mxu0 }
 0xa62   :  { %v1655_v22 = vpop.f32.mrb[30].mxu0 }
 0xa63   :  { %v1659_v26 = vpack.c.bf16 %v1655_v22, %v1652_v4  ;;  %v2672_v27 = vpop.f32.mrb[31].mxu0 }
 0xa65   :  { %2690 = vmatmul.mubr.bf16.vlgmr.msra.gmra.mrb[32].mxu0 %v1659_v26 }
 0xa66   :  { %2721 = vmatprep.mubr.msk.bf16.mxu0 %vm3143_vm0, %v3142_v0 }
 0xb38   :  { %v1694_v28 = vpop.f32.mrb[32].mxu0 }
 0xb39   :  { %v1701_v29 = vadd.f32 %v1694_v28, %v1344_v10  ;;  %v2691_v30 = vpop.f32.mrb[33].mxu0  ;;  %v2253_v10 = vld [vmem:[%s3719_s4 + $0x1] sm:$0x1] }
 0xb3a   :  { %v1697_v31 = vpop.f32.mrb[34].mxu0  ;;  %v2272_v30 = vld [vmem:[%s3728_s13] ss:$0 sm:$0xff] }
 0xb3b   :  { %v1702_v32 = vadd.f32 %v1697_v31, %v1345_v14  ;;  %v2692_v33 = vpop.f32.mrb[35].mxu0  ;;  %v1703_v34 = vmax.f32 %v1701_v29, 0.0 }
 0xb3d   :  { %v1704_v35 = vmax.f32 %v1702_v32, 0.0 }
 0xb3f   :  { %v1705_v36 = vpack.c.bf16 %v1704_v35, %v1703_v34 }
 0xb41   :  { %2694 = vmatpush3.bf16.msra.mxu1 %v1705_v36 }
 0xb42   :  { %2699 = vmatprep.subr.bf16.mxu1 %v3142_v0 }
 0xb44   :  { %2696 = vmatmul.mubr.msk.bf16.vlgmr.msra.gmra.mrb[36].mxu1 %vm606_vm3, %v3623_v24  ;;  %v2888_v24 = vld [vmem:[#allocation16 + $0x28] sm:$0xff]  }
 0xb45   :  { %2700 = vmatpush3.bf16.msra.mxu1 %v2875_v38  ;;  %2715 = vmatprep.mubr.msk.bf16.mxu1 %vm3143_vm0, %v3142_v0 }
 0xb46   :  { %2701 = vmatprep.subr.bf16.mxu1 %v3142_v0 }
 0xb49   :  { %2702 = vmatpush3.bf16.msra.mxu1 %v2876_v39 }
 0xb4a   :  { %2703 = vmatprep.subr.bf16.mxu1 %v3142_v0 }
 0xb4d   :  { %2704 = vmatpush3.bf16.msra.mxu1 %v2877_v40 }
 0xb4e   :  { %2705 = vmatprep.subr.bf16.mxu1 %v3142_v0 }
 0xb51   :  { %2706 = vmatpush3.bf16.msra.mxu1 %v2878_v43 }
 0xb52   :  { %2707 = vmatprep.subr.bf16.mxu1 %v3142_v0 }
 0xb55   :  { %2708 = vmatpush3.bf16.msra.mxu1 %v2879_v44 }
 0xb56   :  { %2709 = vmatprep.subr.bf16.mxu1 %v3142_v0 }
 0xb59   :  { %2710 = vmatpush3.bf16.msra.mxu1 %v2880_v45 }
 0xb5a   :  { %2711 = vmatprep.subr.bf16.mxu1 %v3142_v0 }
 0xb5d   :  { %2712 = vmatpush3.bf16.msra.mxu1 %v2881_v46 }
 0xb5e   :  { %2713 = vmatprep.subr.bf16.mxu1 %v3142_v0 }
 0xb61   :  { %2714 = vmatpush3.bf16.msra.mxu1 %v2882_v47 }
 0xb62   :  { %2745 = vmatprep.subr.bf16.mxu1 %v3142_v0 }
 0xc17   :  { %v1740_v48 = vpop.f32.mrb[36].mxu1 }
 0xc18   :  { %v2697_v49 = vpop.f32.mrb[37].mxu1 }
 0xc19   :  { %v1743_v41 = vpop.f32.mrb[38].mxu1 }
 0xc1a   :  { %v1747_v52 = vpack.c.bf16 %v1743_v41, %v1740_v48  ;;  %v2698_v53 = vpop.f32.mrb[39].mxu1 }
 0xc1c   :  { %2716 = vmatmul.mubr.bf16.vlgmr.msra.gmra.mrb[28].mxu1 %v1747_v52 }
 0xc1d   :  { %2746 = vmatpush3.bf16.msra.mxu1 %v2883_v50  ;;  %2761 = vmatprep.mubr.msk.bf16.mxu1 %vm3143_vm0, %v3142_v0 }
 0xc1e   :  { %2747 = vmatprep.subr.bf16.mxu1 %v3142_v0 }
 0xc21   :  { %2748 = vmatpush3.bf16.msra.mxu1 %v2884_v54 }
 0xc22   :  { %2749 = vmatprep.subr.bf16.mxu1 %v3142_v0 }
 0xc25   :  { %2750 = vmatpush3.bf16.msra.mxu1 %v2885_v55 }
 0xc26   :  { %2751 = vmatprep.subr.bf16.mxu1 %v3142_v0 }
 0xc29   :  { %2752 = vmatpush3.bf16.msra.mxu1 %v2886_v56 }
 0xc2a   :  { %2753 = vmatprep.subr.bf16.mxu1 %v3142_v0 }
 0xc2d   :  { %2754 = vmatpush3.bf16.msra.mxu1 %v2887_v57 }
 0xc2e   :  { %2755 = vmatprep.subr.bf16.mxu1 %v3142_v0 }
 0xc31   :  { %2756 = vmatpush3.bf16.msra.mxu1 %v2888_v24 }
 0xc32   :  { %2757 = vmatprep.subr.bf16.mxu1 %v3142_v0 }
 0xc35   :  { %2758 = vmatpush3.bf16.msra.mxu1 %v2889_v58 }
 0xc36   :  { %2759 = vmatprep.subr.bf16.mxu1 %v3142_v0 }
 0xc39   :  { %2760 = vmatpush3.bf16.msra.mxu1 %v2890_v60 }
 0xc3c   :  { %2762 = vmatmul.mubr.bf16.vlgmr.msra.gmra.mrb[40].mxu1 %v1912_v62 }
 0xcef   :  { %v1847_v1 = vpop.f32.mrb[28].mxu1 }
 0xcf0   :  { %v2767_v2 = vadd.f32 %v1847_v1, %v1366_v25  ;;  %v2717_v3 = vpop.f32.mrb[29].mxu1 }
 0xcf1   :  { %v1850_v5 = vpop.f32.mrb[30].mxu1 }
 0xcf2   :  { %v2768_v6 = vadd.f32 %v1850_v5, %v1366_v25  ;;  %v2718_v37 = vpop.f32.mrb[31].mxu1  ;;  %v1856_v7 = vmax.f32 %v2767_v2, 0.0 }
 0xcf4   :  { %v1857_v8 = vmax.f32 %v2768_v6, 0.0 }
 0xcf6   :  { %v1860_v9 = vpack.c.bf16 %v1857_v8, %v1856_v7 }
 0xcf8   :  { %2720 = vmatpush3.bf16.msra.mxu0 %v1860_v9 }
 0xcf9   :  { %2725 = vmatprep.subr.bf16.mxu0 %v3142_v0 }
 0xcfb   :  { %2722 = vmatmul.mubr.msk.bf16.vlgmr.msra.gmra.mrb[36].mxu0 %vm606_vm3, %v2253_v10 }
 0xcfc   :  { %2726 = vmatpush3.bf16.msra.mxu0 %v2891_v11  ;;  %2741 = vmatprep.mubr.msk.bf16.mxu0 %vm3143_vm0, %v3142_v0 }
 0xcfd   :  { %2727 = vmatprep.subr.bf16.mxu0 %v3142_v0 }
 0xd00   :  { %2728 = vmatpush3.bf16.msra.mxu0 %v2892_v23 }
 0xd01   :  { %2729 = vmatprep.subr.bf16.mxu0 %v3142_v0 }
 0xd04   :  { %2730 = vmatpush3.bf16.msra.mxu0 %v2893_v51 }
 0xd05   :  { %2731 = vmatprep.subr.bf16.mxu0 %v3142_v0 }
 0xd08   :  { %2732 = vmatpush3.bf16.msra.mxu0 %v2894_v42 }
 0xd09   :  { %2733 = vmatprep.subr.bf16.mxu0 %v3142_v0 }
 0xd0c   :  { %2734 = vmatpush3.bf16.msra.mxu0 %v2895_v12 }
 0xd0d   :  { %2735 = vmatprep.subr.bf16.mxu0 %v3142_v0 }
 0xd0f   :  { %v2117_v14 = vpop.f32.mrb[40].mxu1 }
 0xd10   :  { %v2763_v15 = vpop.f32.mrb[41].mxu1  ;;  %2736 = vmatpush3.bf16.msra.mxu0 %v2896_v13 }
 0xd11   :  { %v2120_v17 = vpop.f32.mrb[42].mxu1  ;;  %2737 = vmatprep.subr.bf16.mxu0 %v3142_v0 }
 0xd12   :  { %v2764_v18 = vpop.f32.mrb[43].mxu1 }
 0xd14   :  { %2738 = vmatpush3.bf16.msra.mxu0 %v2897_v16 }
 0xd15   :  { %2739 = vmatprep.subr.bf16.mxu0 %v3142_v0 }
 0xd18   :  { %2740 = vmatpush3.bf16.msra.mxu0 %v2898_v19 }
 0xdce   :  { %v1898_v4 = vpop.f32.mrb[36].mxu0 }
 0xdcf   :  { %v1911_v21 = vmul.f32 %v1909_v20, %v1898_v4  ;;  %v2723_v22 = vpop.f32.mrb[37].mxu0 }
 0xdd0   :  { %v1901_v26 = vpop.f32.mrb[38].mxu0 }
 0xdd1   :  { %v1929_v27 = vpack.c.bf16 %v1911_v21, %v1911_v21  ;;  %v2724_v28 = vpop.f32.mrb[39].mxu0 }
 0xdd3   :  { %2742 = vmatmul.mubr.bf16.vlgmr.msra.gmra.mrb[40].mxu0 %v1929_v27 }
 0xea6   :  { %v2029_v29 = vpop.f32.mrb[40].mxu0 }
 0xea7   :  { %v2118_v31 = vadd.f32 %v2117_v14, %v2029_v29  ;;  %v2743_v32 = vpop.f32.mrb[41].mxu0 }
 0xea8   :  { %v2032_v0 = vpop.f32.mrb[42].mxu0 }
 0xea9   :  { %v2130_v33 = vadd.f32 %v2272_v30, %v2118_v31  ;;  %v2744_v34 = vpop.f32.mrb[43].mxu0 }
 0xeab   :  { %2131 = vst [vmem:[#allocation17] sm:$0x3] %v2130_v33 }
 0xeac   :  { %3108 = shalt.err (!%p3105_p6)
}
 0xead   :  { %s3109_s13 = scalar_lea.hbm %s3729_s14, 32 }
 0xeae   :  { %p3110_p7 = scmp.ne.s32.totalorder %s3729_s14, %s3109_s13  ;;  %p3113_p8 = scmp.lt.u32.totalorder %s3109_s13, %s3729_s14 }
 0xeb0   :  { %p3115_p9 = pnand %p3113_p8, %p3110_p7 }
 0xeb2   :  { %3118 = shalt.err (!%p3115_p9)
}
 0xeb3   :  { %2141 = dma.vmem_to_hbm [thread:$0]  %s2139_s28, 32, %s3729_s14, [#allocation4]  }
 0xeb4   :  { %3129 = dma.done.wait [#allocation4], 32  }
 0xeb5   :  { %3130 = vsyncadd [#allocation4], 4294967264 }
 0xeb6   :  { %2145 = vsyncpa [#allocation3], 1 }
 0xeb7   :  { %2146 = vsyncpa [#allocation6], 1 }
 0xeb8   :  { %2147 = vsyncpa [#allocation9], 1 }
 0xeb9   :  { %2148 = vsyncpa [#allocation12], 1 }
 0xeba   :  { %2149 = vsyncpa [#allocation15], 1 }
 0xebb   :  { %2150 = vsyncpa [#allocation4], 1 }

</bundles_post_ra>
